<compile_context>
chip_gen: v5e
topology: v5e:2x2
jax: 0.10.0
libtpu: 0.0.40
codegen_flags: <defaults>
</compile_context>

<pallas_src>
import functools

import jax
import jax.numpy as jnp
from jax.experimental import pallas as pl
from jax.experimental.pallas import tpu as pltpu

LANE_PAD = 128  # pad output columns to a full lane width for unmasked stores


def qnetwork_kernel(x_ref, w1_ref, b1_ref, wh_ref, bh_ref, w3_ref, b3_ref, out_ref):
    # Layer 1: (TB, S) @ (S, M) -> (TB, M). x is already bf16 (cast in wrapper).
    h = jnp.dot(x_ref[...], w1_ref[...],
                preferred_element_type=jnp.float32) + b1_ref[...]
    h = jnp.maximum(h, 0.0)

    # Hidden layers 2, 2p1, 2p2 (packed into one (3, M, M) tensor, unrolled in Python).
    for l in range(wh_ref.shape[0]):
        h = jnp.dot(h.astype(jnp.bfloat16), wh_ref[l],
                    preferred_element_type=jnp.float32) + bh_ref[l]
        h = jnp.maximum(h, 0.0)

    # Output layer (columns zero-padded to LANE_PAD; no activation). Store bf16.
    q = jnp.dot(h.astype(jnp.bfloat16), w3_ref[...],
                preferred_element_type=jnp.float32) + b3_ref[...]
    out_ref[...] = q.astype(out_ref.dtype)


def _round_up(n, m):
    return ((n + m - 1) // m) * m


def _pick_batch_tile(B, block_b):
    """Largest MXU-friendly batch tile that still leaves >=2 grid steps when possible
    (so v7x's two TensorCores both get work under dimension_semantics=("parallel",))."""
    if B <= 8:
        return B  # single tile; block == full dim is legal even when not 8-aligned
    tb = min(block_b, B)
    if tb >= B:  # would collapse to a single grid step -> split roughly in half
        tb = max(8, _round_up((B + 1) // 2, 8))
    return tb


@functools.partial(jax.jit, static_argnames=("action_dim", "block_b"))
def qnetwork_forward(x, packed, *, action_dim, block_b=256):
    """x: (B, state_dim) f32. packed: dict from pack_params(). Returns (B, action_dim) f32."""
    B, state_dim = x.shape
    pad_out = packed["w3p"].shape[1]

    tb = _pick_batch_tile(B, block_b)
    grid = (pl.cdiv(B, tb),)

    x_bf16 = x.astype(jnp.bfloat16)  # halve x DMA; MXU eats bf16 natively

    in_specs = [
        pl.BlockSpec((tb, state_dim), lambda i: (i, 0)),           # x: tiled over batch
        pl.BlockSpec(packed["w1"].shape, lambda i: (0, 0)),         # weights: VMEM-resident
        pl.BlockSpec(packed["b1"].shape, lambda i: (0, 0)),
        pl.BlockSpec(packed["wh"].shape, lambda i: (0, 0, 0)),
        pl.BlockSpec(packed["bh"].shape, lambda i: (0, 0, 0)),
        pl.BlockSpec(packed["w3p"].shape, lambda i: (0, 0)),
        pl.BlockSpec(packed["b3p"].shape, lambda i: (0, 0)),
    ]
    out_specs = pl.BlockSpec((tb, pad_out), lambda i: (i, 0))

    q_padded = pl.pallas_call(
        qnetwork_kernel,
        out_shape=jax.ShapeDtypeStruct((B, pad_out), jnp.bfloat16),  # bf16 writeback
        grid=grid,
        in_specs=in_specs,
        out_specs=out_specs,
        compiler_params=pltpu.CompilerParams(dimension_semantics=("parallel",)),
    )(x_bf16, packed["w1"], packed["b1"], packed["wh"], packed["bh"],
      packed["w3p"], packed["b3p"])

    # Drop the zero-padded lanes (static slice) and return f32 outside the kernel.
    return q_padded[:, :action_dim].astype(jnp.float32)


def init_params(key, state_dim, action_dim, middle_dim):
    """Deterministic synthetic init (uniform, roughly matching nn.Linear scale). f32."""
    dims = [
        ("w1", "b1", state_dim, middle_dim),
        ("w2", "b2", middle_dim, middle_dim),
        ("w2p1", "b2p1", middle_dim, middle_dim),
        ("w2p2", "b2p2", middle_dim, middle_dim),
        ("w3", "b3", middle_dim, action_dim),
    ]
    params = {}
    for wname, bname, din, dout in dims:
        key, kw, kb = jax.random.split(key, 3)
        bound = 1.0 / jnp.sqrt(jnp.float32(din))
        params[wname] = jax.random.uniform(
            kw, (din, dout), jnp.float32, minval=-bound, maxval=bound)
        params[bname] = jax.random.uniform(
            kb, (1, dout), jnp.float32, minval=-bound, maxval=bound)
    return params


def pack_params(params, pad_out=LANE_PAD):
    """Pack hidden layers, cast weights to bf16, zero-pad the output layer columns.

    NOTE: weights are kept bf16 for cross-generation portability (v7x MXU has no int8
    path). For v5e/v6e-only deployments, int8 weights + per-channel f32 scales would
    halve the dominant weight-DMA cost; fp8 (e4m3) is the v7x analogue.
    """
    mid = params["w2"].shape[0]
    action_dim = params["w3"].shape[1]
    pad = max(pad_out, action_dim)

    w3p = jnp.zeros((mid, pad), jnp.float32).at[:, :action_dim].set(params["w3"])
    b3p = jnp.zeros((1, pad), jnp.float32).at[:, :action_dim].set(params["b3"])

    return {
        "w1": params["w1"].astype(jnp.bfloat16),
        "b1": params["b1"],  # biases stay f32
        "wh": jnp.stack([params["w2"], params["w2p1"], params["w2p2"]]).astype(jnp.bfloat16),
        "bh": jnp.stack([params["b2"], params["b2p1"], params["b2p2"]]),
        "w3p": w3p.astype(jnp.bfloat16),
        "b3p": b3p,
    }


def reference_forward(x, params):
    """Pure-JAX reference mirroring the kernel's bf16-input / f32-accumulate math
    (including the bf16 output store)."""
    def layer(h, w, b, relu=True):
        y = jnp.dot(h.astype(jnp.bfloat16), w.astype(jnp.bfloat16),
                    preferred_element_type=jnp.float32) + b
        return jnp.maximum(y, 0.0) if relu else y

    h = layer(x, params["w1"], params["b1"])
    h = layer(h, params["w2"], params["b2"])
    h = layer(h, params["w2p1"], params["b2p1"])
    h = layer(h, params["w2p2"], params["b2p2"])
    q = layer(h, params["w3"], params["b3"], relu=False)
    return q.astype(jnp.bfloat16).astype(jnp.float32)


if __name__ == "__main__":
    state_dim, action_dim, middle_dim = 16, 4, 256  # module default middle_dim=256
    batch = 256                                     # splits into 2 batch tiles of 128 rows

    key = jax.random.PRNGKey(0)
    key, kx = jax.random.split(key)
    x = jax.random.normal(kx, (batch, state_dim), jnp.float32)

    params = init_params(key, state_dim, action_dim, middle_dim)
    packed = pack_params(params)

    q = qnetwork_forward(x, packed, action_dim=action_dim)
    q = jax.block_until_ready(q)

    q_ref = reference_forward(x, params)
    assert q.shape == (batch, action_dim)
    assert jnp.allclose(q, q_ref, atol=2e-2, rtol=2e-2), "mismatch vs JAX reference"

    print("KERNEL_OK")
</pallas_src>

<mosaic_0001>
module attributes {stable_mosaic.version = 11 : i64} {
  func.func @qnetwork_kernel(%arg0: i32, %arg1: memref<128x16xbf16, #tpu.memory_space<vmem>>, %arg2: memref<16x256xbf16, #tpu.memory_space<vmem>>, %arg3: memref<1x256xf32, #tpu.memory_space<vmem>>, %arg4: memref<3x256x256xbf16, #tpu.memory_space<vmem>>, %arg5: memref<3x1x256xf32, #tpu.memory_space<vmem>>, %arg6: memref<256x128xbf16, #tpu.memory_space<vmem>>, %arg7: memref<1x128xf32, #tpu.memory_space<vmem>>, %arg8: memref<128x128xbf16, #tpu.memory_space<vmem>>) attributes {dimension_semantics = [#tpu.dimension_semantics<parallel>], iteration_bounds = array<i64: 2>, scalar_prefetch = 0 : i64, scratch_operands = 0 : i64, tpu.core_type = #tpu.core_type<tc>, window_params = [{transform_indices = @transform_0, window_bounds = array<i64: 128, 16>}, {pipeline_mode = #tpu.pipeline_mode<synchronous>, transform_indices = @transform_1, window_bounds = array<i64: 16, 256>}, {pipeline_mode = #tpu.pipeline_mode<synchronous>, transform_indices = @transform_2, window_bounds = array<i64: 1, 256>}, {pipeline_mode = #tpu.pipeline_mode<synchronous>, transform_indices = @transform_3, window_bounds = array<i64: 3, 256, 256>}, {pipeline_mode = #tpu.pipeline_mode<synchronous>, transform_indices = @transform_4, window_bounds = array<i64: 3, 1, 256>}, {pipeline_mode = #tpu.pipeline_mode<synchronous>, transform_indices = @transform_5, window_bounds = array<i64: 256, 128>}, {pipeline_mode = #tpu.pipeline_mode<synchronous>, transform_indices = @transform_6, window_bounds = array<i64: 1, 128>}, {transform_indices = @transform_7, window_bounds = array<i64: 128, 128>}]} {
    %c0 = arith.constant 0 : index
    %c0_0 = arith.constant 0 : index
    %0 = vector.load %arg1[%c0, %c0_0] : memref<128x16xbf16, #tpu.memory_space<vmem>>, vector<128x16xbf16>
    %c0_1 = arith.constant 0 : index
    %c0_2 = arith.constant 0 : index
    %1 = vector.load %arg2[%c0_1, %c0_2] : memref<16x256xbf16, #tpu.memory_space<vmem>>, vector<16x256xbf16>
    %cst = arith.constant dense<0.000000e+00> : vector<128x256xf32>
    %2 = tpu.matmul %0, %1, %cst {dimension_numbers = #tpu.dot_dimension_numbers<[1], [0], [0], [1], [0, 0, 1, 1], [], []>} : vector<128x16xbf16>, vector<16x256xbf16>, vector<128x256xf32> -> vector<128x256xf32>
    %c0_3 = arith.constant 0 : index
    %c0_4 = arith.constant 0 : index
    %3 = vector.load %arg3[%c0_3, %c0_4] : memref<1x256xf32, #tpu.memory_space<vmem>>, vector<1x256xf32>
    %4 = vector.broadcast %3 : vector<1x256xf32> to vector<128x256xf32>
    %5 = arith.addf %2, %4 : vector<128x256xf32>
    %cst_5 = arith.constant 0.000000e+00 : f32
    %6 = vector.broadcast %cst_5 : f32 to vector<128x256xf32>
    %7 = arith.maximumf %5, %6 : vector<128x256xf32>
    %8 = arith.truncf %7 : vector<128x256xf32> to vector<128x256xbf16>
    %c0_6 = arith.constant 0 : index
    %c0_7 = arith.constant 0 : index
    %c0_8 = arith.constant 0 : index
    %9 = vector.load %arg4[%c0_6, %c0_7, %c0_8] : memref<3x256x256xbf16, #tpu.memory_space<vmem>>, vector<1x256x256xbf16>
    %10 = vector.shape_cast %9 : vector<1x256x256xbf16> to vector<256x256xbf16>
    %cst_9 = arith.constant dense<0.000000e+00> : vector<128x256xf32>
    %11 = tpu.matmul %8, %10, %cst_9 {dimension_numbers = #tpu.dot_dimension_numbers<[1], [0], [0], [1], [0, 0, 1, 1], [], []>} : vector<128x256xbf16>, vector<256x256xbf16>, vector<128x256xf32> -> vector<128x256xf32>
    %c0_10 = arith.constant 0 : index
    %c0_11 = arith.constant 0 : index
    %c0_12 = arith.constant 0 : index
    %12 = vector.load %arg5[%c0_10, %c0_11, %c0_12] : memref<3x1x256xf32, #tpu.memory_space<vmem>>, vector<1x1x256xf32>
    %13 = vector.shape_cast %12 : vector<1x1x256xf32> to vector<1x256xf32>
    %14 = vector.broadcast %13 : vector<1x256xf32> to vector<128x256xf32>
    %15 = arith.addf %11, %14 : vector<128x256xf32>
    %cst_13 = arith.constant 0.000000e+00 : f32
    %16 = vector.broadcast %cst_13 : f32 to vector<128x256xf32>
    %17 = arith.maximumf %15, %16 : vector<128x256xf32>
    %18 = arith.truncf %17 : vector<128x256xf32> to vector<128x256xbf16>
    %c1 = arith.constant 1 : index
    %c0_14 = arith.constant 0 : index
    %c0_15 = arith.constant 0 : index
    %19 = vector.load %arg4[%c1, %c0_14, %c0_15] : memref<3x256x256xbf16, #tpu.memory_space<vmem>>, vector<1x256x256xbf16>
    %20 = vector.shape_cast %19 : vector<1x256x256xbf16> to vector<256x256xbf16>
    %cst_16 = arith.constant dense<0.000000e+00> : vector<128x256xf32>
    %21 = tpu.matmul %18, %20, %cst_16 {dimension_numbers = #tpu.dot_dimension_numbers<[1], [0], [0], [1], [0, 0, 1, 1], [], []>} : vector<128x256xbf16>, vector<256x256xbf16>, vector<128x256xf32> -> vector<128x256xf32>
    %c1_17 = arith.constant 1 : index
    %c0_18 = arith.constant 0 : index
    %c0_19 = arith.constant 0 : index
    %22 = vector.load %arg5[%c1_17, %c0_18, %c0_19] : memref<3x1x256xf32, #tpu.memory_space<vmem>>, vector<1x1x256xf32>
    %23 = vector.shape_cast %22 : vector<1x1x256xf32> to vector<1x256xf32>
    %24 = vector.broadcast %23 : vector<1x256xf32> to vector<128x256xf32>
    %25 = arith.addf %21, %24 : vector<128x256xf32>
    %cst_20 = arith.constant 0.000000e+00 : f32
    %26 = vector.broadcast %cst_20 : f32 to vector<128x256xf32>
    %27 = arith.maximumf %25, %26 : vector<128x256xf32>
    %28 = arith.truncf %27 : vector<128x256xf32> to vector<128x256xbf16>
    %c2 = arith.constant 2 : index
    %c0_21 = arith.constant 0 : index
    %c0_22 = arith.constant 0 : index
    %29 = vector.load %arg4[%c2, %c0_21, %c0_22] : memref<3x256x256xbf16, #tpu.memory_space<vmem>>, vector<1x256x256xbf16>
    %30 = vector.shape_cast %29 : vector<1x256x256xbf16> to vector<256x256xbf16>
    %cst_23 = arith.constant dense<0.000000e+00> : vector<128x256xf32>
    %31 = tpu.matmul %28, %30, %cst_23 {dimension_numbers = #tpu.dot_dimension_numbers<[1], [0], [0], [1], [0, 0, 1, 1], [], []>} : vector<128x256xbf16>, vector<256x256xbf16>, vector<128x256xf32> -> vector<128x256xf32>
    %c2_24 = arith.constant 2 : index
    %c0_25 = arith.constant 0 : index
    %c0_26 = arith.constant 0 : index
    %32 = vector.load %arg5[%c2_24, %c0_25, %c0_26] : memref<3x1x256xf32, #tpu.memory_space<vmem>>, vector<1x1x256xf32>
    %33 = vector.shape_cast %32 : vector<1x1x256xf32> to vector<1x256xf32>
    %34 = vector.broadcast %33 : vector<1x256xf32> to vector<128x256xf32>
    %35 = arith.addf %31, %34 : vector<128x256xf32>
    %cst_27 = arith.constant 0.000000e+00 : f32
    %36 = vector.broadcast %cst_27 : f32 to vector<128x256xf32>
    %37 = arith.maximumf %35, %36 : vector<128x256xf32>
    %38 = arith.truncf %37 : vector<128x256xf32> to vector<128x256xbf16>
    %c0_28 = arith.constant 0 : index
    %c0_29 = arith.constant 0 : index
    %39 = vector.load %arg6[%c0_28, %c0_29] : memref<256x128xbf16, #tpu.memory_space<vmem>>, vector<256x128xbf16>
    %cst_30 = arith.constant dense<0.000000e+00> : vector<128x128xf32>
    %40 = tpu.matmul %38, %39, %cst_30 {dimension_numbers = #tpu.dot_dimension_numbers<[1], [0], [0], [1], [0, 0, 1, 1], [], []>} : vector<128x256xbf16>, vector<256x128xbf16>, vector<128x128xf32> -> vector<128x128xf32>
    %c0_31 = arith.constant 0 : index
    %c0_32 = arith.constant 0 : index
    %41 = vector.load %arg7[%c0_31, %c0_32] : memref<1x128xf32, #tpu.memory_space<vmem>>, vector<1x128xf32>
    %42 = vector.broadcast %41 : vector<1x128xf32> to vector<128x128xf32>
    %43 = arith.addf %40, %42 : vector<128x128xf32>
    %44 = arith.truncf %43 : vector<128x128xf32> to vector<128x128xbf16>
    %c0_33 = arith.constant 0 : index
    %c0_34 = arith.constant 0 : index
    %45 = vector.load %arg8[%c0_33, %c0_34] : memref<128x128xbf16, #tpu.memory_space<vmem>>, vector<128x128xbf16>
    tpu.vector_store %arg8[%c0_33, %c0_34], %44 {strides = array<i32>} : memref<128x128xbf16, #tpu.memory_space<vmem>>, vector<128x128xbf16>,
    return
  }
  func.func @transform_0(%arg0: i32) -> (i32, i32) {
    %c0_i32 = arith.constant 0 : i32
    %c0_i32_0 = arith.constant 0 : i32
    return %arg0, %c0_i32 : i32, i32
  }
  func.func @transform_1(%arg0: i32) -> (i32, i32) {
    %c0_i32 = arith.constant 0 : i32
    %c0_i32_0 = arith.constant 0 : i32
    %c0_i32_1 = arith.constant 0 : i32
    return %c0_i32, %c0_i32_0 : i32, i32
  }
  func.func @transform_2(%arg0: i32) -> (i32, i32) {
    %c0_i32 = arith.constant 0 : i32
    %c0_i32_0 = arith.constant 0 : i32
    %c0_i32_1 = arith.constant 0 : i32
    return %c0_i32, %c0_i32_0 : i32, i32
  }
  func.func @transform_3(%arg0: i32) -> (i32, i32, i32) {
    %c0_i32 = arith.constant 0 : i32
    %c0_i32_0 = arith.constant 0 : i32
    %c0_i32_1 = arith.constant 0 : i32
    %c0_i32_2 = arith.constant 0 : i32
    return %c0_i32, %c0_i32_0, %c0_i32_1 : i32, i32, i32
  }
  func.func @transform_4(%arg0: i32) -> (i32, i32, i32) {
    %c0_i32 = arith.constant 0 : i32
    %c0_i32_0 = arith.constant 0 : i32
    %c0_i32_1 = arith.constant 0 : i32
    %c0_i32_2 = arith.constant 0 : i32
    return %c0_i32, %c0_i32_0, %c0_i32_1 : i32, i32, i32
  }
  func.func @transform_5(%arg0: i32) -> (i32, i32) {
    %c0_i32 = arith.constant 0 : i32
    %c0_i32_0 = arith.constant 0 : i32
    %c0_i32_1 = arith.constant 0 : i32
    return %c0_i32, %c0_i32_0 : i32, i32
  }
  func.func @transform_6(%arg0: i32) -> (i32, i32) {
    %c0_i32 = arith.constant 0 : i32
    %c0_i32_0 = arith.constant 0 : i32
    %c0_i32_1 = arith.constant 0 : i32
    return %c0_i32, %c0_i32_0 : i32, i32
  }
  func.func @transform_7(%arg0: i32) -> (i32, i32) {
    %c0_i32 = arith.constant 0 : i32
    %c0_i32_0 = arith.constant 0 : i32
    return %arg0, %c0_i32 : i32, i32
  }
}

</mosaic_0001>

<bundles_post_ra>
// kernel: qnetwork_forward.1
= control target key start
LH: loop header
LB: loop body
LE: loop exit
PB: predicated region body
PF: predicated region fallthrough
CT: control target
= control target key end

     0   :  { %12 = vsyncpa [#allocation3], 0  ;;  %s3000_s24 = smov 0   ;;  %s3300_s0 = inlined_call_operand.vmem [shape: bf16[256,16], index: 0, kind: input, shape index: {}]   ;;  %s3301_s1 = inlined_call_operand.vmem [shape: bf16[16,256], index: 1, kind: input, shape index: {}]   ;;  %s3302_s2 = inlined_call_operand.vmem [shape: f32[1,256], index: 2, kind: input, shape index: {}]   ;;  %s3303_s3 = inlined_call_operand.hbm [shape: bf16[3,256,256], index: 3, kind: input, shape index: {}]   ;;  %s3304_s4 = inlined_call_operand.vmem [shape: f32[3,1,256], index: 4, kind: input, shape index: {}]   ;;  %s3305_s5 = inlined_call_operand.vmem [shape: bf16[256,128], index: 5, kind: input, shape index: {}]   ;;  %s3306_s6 = inlined_call_operand.vmem [shape: f32[1,128], index: 6, kind: input, shape index: {}]   ;;  %s3307_s7 = inlined_call_operand.vmem [shape: bf16[256,128], index: 7, kind: output, shape index: {}]  }
   0x1 LB: > { %s218_s27 = sshll.u32 %s3303_s3, 4  ;;  %s2205_s28 = sadd.s32 4294967295, %s2955_s24   ;;  %s2955_s24 = sphi %s3000_s24, %s18_s24   ;;  %s219_s27 = int_to_ptr.hbm [resolvable:$true] %s218_s27 }
   0x2   : > { %p2207_p0 = scmp.ge.s32.totalorder %s2955_s24, 1  ;;  %p201_p1 = scmp.lt.s32.totalorder %s2955_s24, 3 }
   0x3   : > { %p2901_p2 = scmp.eq.s32.totalorder %s2205_s28, 0  ;;  %s2957_s29 = smov [#allocation2]  }
   0x4   : > { %p202_p3 = pnand %p2207_p0, %p201_p1  ;;  %s220_s30 = sshll.u32 %s2957_s29, 4  ;;  %s221_s30 = int_to_ptr.vmem [resolvable:$true] %s220_s30 }
   0x5   : > { %s2958_s8 = smov 128   ;;  %s2959_s9 = smov 8  }
   0x6   : > { %p2897_p4 = pneg %p202_p3  ;;  %254 = sbr.rel (%p202_p3) target bundleno = 862 (0x35e), region = 48 }
   0x8   : > { %p2898_p5 = pnand %p2901_p2, %p2897_p4 }
   0xa   : > { %2900 = dma.hbm_to_vmem [thread:$0]  (!%p2898_p5), %s219_s27, 12288, %s221_s30, [#allocation3], %s2958_s8, %s2958_s8, %s2959_s9  }
   0xb   : > { %2950 = dma.done.wait (%p2901_p2), [#allocation3], 12288  }
   0xc   : > { %2952 = vsyncadd (%p2901_p2), [#allocation3], 4294955008  ;;  %s2212_s10 = sshll.u32 %s2205_s28, 4  ;;  %v2250_v0 = vld [vmem:[%s3301_s1] sm:$0xf]  ;;  %vm374_vm0 = vcmask 130048  }
   0xd   : > { %p288_p6 = scmp.lt.s32.totalorder %s2212_s10, 31  ;;  %v2733_v1 = vld [vmem:[%s3301_s1 + $0x4] sm:$0xf0]  ;;  %v2732_v2 = vld [vmem:[%s3301_s1 + $0x4] sm:$0xf] }
   0xe   : > { %v2251_v3 = vor.u32 %v2733_v1, %v2250_v0  ;;  %v2252_v4 = vld [vmem:[%s3301_s1 + $0x8] sm:$0xf0]  ;;  %v2748_v7 = vld [vmem:[#allocation2 + $0x74] sm:$0xf]  ;;  %v2332_v8 = vld [vmem:[#allocation2 + $0x78] sm:$0xf0] }
   0xf   : > { %s3309_s10 = smov (!%p288_p6, %s2212_s10), 31  ;;  %v2255_v6 = vor.u32 %v2732_v2, %v2252_v4  ;;  %v2764_v9 = vld [vmem:[#allocation2 + $0xf4] sm:$0xf]  ;;  %v2335_v10 = vor.u32 %v2748_v7, %v2332_v8  ;;  %v2396_v11 = vld [vmem:[#allocation2 + $0xf8] sm:$0xf0] }
  0x10   : > { %s2213_s11 = sshll.u32 %s3309_s10, 2  ;;  %406 = vmatpush.bf16.msra.mxu0 %v2251_v3  ;;  %v2399_v12 = vor.u32 %v2764_v9, %v2396_v11  ;;  %v2746_v13 = vld [vmem:[#allocation2 + $0x64] sm:$0xf]  ;;  %v2324_v14 = vld [vmem:[#allocation2 + $0x68] sm:$0xf0] }
  0x11   : > { %s3019_s14 = scalar_lea.vmem %s3300_s0, %s2213_s11  ;;  %455 = vmatpush.bf16.msra.mxu1 %v2255_v6  ;;  %v2762_v15 = vld [vmem:[#allocation2 + $0xe4] sm:$0xf]  ;;  %v2327_v16 = vor.u32 %v2746_v13, %v2324_v14  ;;  %v2388_v17 = vld [vmem:[#allocation2 + $0xe8] sm:$0xf0]  ;;  %v2744_v20 = vld [vmem:[#allocation2 + $0x54] sm:$0xf]  ;;  %s3273_s28 = scalar_lea.vmem %s3307_s7, %s2213_s11 }
  0x12   : > { %v2724_v5 = vld [vmem:[%s3019_s14] sm:$0xff]  ;;  %v2391_v18 = vor.u32 %v2762_v15, %v2388_v17  ;;  %v2725_v19 = vld [vmem:[%s3019_s14 + $0x8] sm:$0xff]  ;;  %v2316_v21 = vld [vmem:[#allocation2 + $0x58] sm:$0xf0] }
  0x13   : > { %2256 = vmatmul.msk.bf16.vlgmr.msra.gmra.mxu0 %vm374_vm0, %v2724_v5  ;;  %v2760_v22 = vld [vmem:[#allocation2 + $0xd4] sm:$0xf]  ;;  %v2319_v23 = vor.u32 %v2744_v20, %v2316_v21  ;;  %v2380_v24 = vld [vmem:[#allocation2 + $0xd8] sm:$0xf0]  ;;  %v2742_v27 = vld [vmem:[#allocation2 + $0x44] sm:$0xf] }
  0x14   : > { %841 = vmatpush.bf16.msrb.mxu0 %v2335_v10  ;;  %2264 = vmatmul.msk.bf16.vlgmr.msra.gmra.mxu1 %vm374_vm0, %v2724_v5  ;;  %v2383_v25 = vor.u32 %v2760_v22, %v2380_v24  ;;  %v2726_v26 = vld [vmem:[%s3019_s14 + $0x10] sm:$0xff]  ;;  %v2308_v28 = vld [vmem:[#allocation2 + $0x48] sm:$0xf0]  ;;  %v2758_v29 = vld [vmem:[#allocation2 + $0xc4] sm:$0xf] }
  0x15   : > { %890 = vmatpush.bf16.msrb.mxu1 %v2399_v12  ;;  %v2311_v30 = vor.u32 %v2742_v27, %v2308_v28  ;;  %v2372_v31 = vld [vmem:[#allocation2 + $0xc8] sm:$0xf0]  ;;  %v2727_v33 = vld [vmem:[%s3019_s14 + $0x18] sm:$0xff]  ;;  %v2740_v34 = vld [vmem:[#allocation2 + $0x34] sm:$0xf] }
  0x16   : > { %v2375_v32 = vor.u32 %v2758_v29, %v2372_v31  ;;  %v2300_v35 = vld [vmem:[#allocation2 + $0x38] sm:$0xf0]  ;;  %v2756_v36 = vld [vmem:[#allocation2 + $0xb4] sm:$0xf]  ;;  %v2728_v40 = vld [vmem:[%s3019_s14 + $0x20] sm:$0xff] }
  0x17   : > { %v2303_v37 = vor.u32 %v2740_v34, %v2300_v35  ;;  %v2364_v38 = vld [vmem:[#allocation2 + $0xb8] sm:$0xf0]  ;;  %v2738_v41 = vld [vmem:[#allocation2 + $0x24] sm:$0xf]  ;;  %v2292_v42 = vld [vmem:[#allocation2 + $0x28] sm:$0xf0] }
  0x18   : > { %842 = vmatpush.bf16.msrb.mxu0 %v2327_v16  ;;  %v2367_v39 = vor.u32 %v2756_v36, %v2364_v38  ;;  %v2754_v43 = vld [vmem:[#allocation2 + $0xa4] sm:$0xf]  ;;  %v2295_v44 = vor.u32 %v2738_v41, %v2292_v42  ;;  %v2356_v45 = vld [vmem:[#allocation2 + $0xa8] sm:$0xf0]  ;;  %v2330_v46 = vld [vmem:[#allocation2 + $0x70] sm:$0xf] }
  0x19   : > { %891 = vmatpush.bf16.msrb.mxu1 %v2391_v18  ;;  %v2749_v47 = vld [vmem:[#allocation2 + $0x74] sm:$0xf0]  ;;  %v2359_v48 = vor.u32 %v2754_v43, %v2356_v45  ;;  %v2394_v50 = vld [vmem:[#allocation2 + $0xf0] sm:$0xf]  ;;  %v2729_v53 = vld [vmem:[%s3019_s14 + $0x28] sm:$0xff] }
  0x1a   : > { %v2331_v49 = vor.u32 %v2749_v47, %v2330_v46  ;;  %v2765_v51 = vld [vmem:[#allocation2 + $0xf4] sm:$0xf0]  ;;  %v2322_v54 = vld [vmem:[#allocation2 + $0x60] sm:$0xf]  ;;  %v2747_v55 = vld [vmem:[#allocation2 + $0x64] sm:$0xf0] }
  0x1b   : > { %v2395_v52 = vor.u32 %v2765_v51, %v2394_v50  ;;  %v2386_v56 = vld [vmem:[#allocation2 + $0xe0] sm:$0xf]  ;;  %v2323_v57 = vor.u32 %v2747_v55, %v2322_v54  ;;  %v2763_v58 = vld [vmem:[#allocation2 + $0xe4] sm:$0xf0]  ;;  %v2736_v60 = vld [vmem:[#allocation2 + $0x14] sm:$0xf] }
  0x1c   : > { %843 = vmatpush.bf16.msrb.mxu0 %v2319_v23  ;;  %743 = vmatpush.bf16.msra.mxu2 %v2331_v49  ;;  %v2387_v59 = vor.u32 %v2763_v58, %v2386_v56  ;;  %v2284_v61 = vld [vmem:[#allocation2 + $0x18] sm:$0xf0]  ;;  %v2314_v62 = vld [vmem:[#allocation2 + $0x50] sm:$0xf]  ;;  %v2745_v0 = vld [vmem:[#allocation2 + $0x54] sm:$0xf0] }
  0x1d   : > { %892 = vmatpush.bf16.msrb.mxu1 %v2383_v25  ;;  %792 = vmatpush.bf16.msra.mxu3 %v2395_v52  ;;  %v2287_v63 = vor.u32 %v2736_v60, %v2284_v61  ;;  %v2378_v1 = vld [vmem:[#allocation2 + $0xd0] sm:$0xf]  ;;  %v2761_v2 = vld [vmem:[#allocation2 + $0xd4] sm:$0xf0]  ;;  %v2315_v3 = vor.u32 %v2745_v0, %v2314_v62  ;;  %v2752_v5 = vld [vmem:[#allocation2 + $0x94] sm:$0xf] }
  0x1e   : > { %v2379_v4 = vor.u32 %v2761_v2, %v2378_v1  ;;  %v2348_v6 = vld [vmem:[#allocation2 + $0x98] sm:$0xf0]  ;;  %v2306_v7 = vld [vmem:[#allocation2 + $0x40] sm:$0xf]  ;;  %v2743_v9 = vld [vmem:[#allocation2 + $0x44] sm:$0xf0] }
  0x1f   : > { %v2351_v8 = vor.u32 %v2752_v5, %v2348_v6  ;;  %v2370_v10 = vld [vmem:[#allocation2 + $0xc0] sm:$0xf]  ;;  %v2759_v11 = vld [vmem:[#allocation2 + $0xc4] sm:$0xf0]  ;;  %v2307_v12 = vor.u32 %v2743_v9, %v2306_v7  ;;  %v2298_v14 = vld [vmem:[#allocation2 + $0x30] sm:$0xf] }
  0x20   : > { %844 = vmatpush.bf16.msrb.mxu0 %v2311_v30  ;;  %744 = vmatpush.bf16.msra.mxu2 %v2323_v57  ;;  %v2371_v13 = vor.u32 %v2759_v11, %v2370_v10  ;;  %v2741_v15 = vld [vmem:[#allocation2 + $0x34] sm:$0xf0]  ;;  %v2362_v16 = vld [vmem:[#allocation2 + $0xb0] sm:$0xf]  ;;  %v2290_v21 = vld [vmem:[#allocation2 + $0x20] sm:$0xf] }
  0x21   : > { %893 = vmatpush.bf16.msrb.mxu1 %v2375_v32  ;;  %793 = vmatpush.bf16.msra.mxu3 %v2387_v59  ;;  %v2730_v17 = vld [vmem:[%s3019_s14 + $0x30] sm:$0xff]  ;;  %v2299_v18 = vor.u32 %v2741_v15, %v2298_v14  ;;  %v2739_v22 = vld [vmem:[#allocation2 + $0x24] sm:$0xf0]  ;;  %v2354_v24 = vld [vmem:[#allocation2 + $0xa0] sm:$0xf] }
  0x22   : > { %v2291_v23 = vor.u32 %v2739_v22, %v2290_v21  ;;  %v2755_v25 = vld [vmem:[#allocation2 + $0xa4] sm:$0xf0]  ;;  %v2734_v27 = vld [vmem:[#allocation2 + $0x4] sm:$0xf]  ;;  %v2276_v28 = vld [vmem:[#allocation2 + $0x8] sm:$0xf0] }
  0x23   : > { %2257 = vmatmul.msk.bf16.gmra.mxu0 %vm374_vm0, %v2725_v19  ;;  %v2279_v29 = vor.u32 %v2734_v27, %v2276_v28  ;;  %v2282_v30 = vld [vmem:[#allocation2 + $0x10] sm:$0xf]  ;;  %v2737_v31 = vld [vmem:[#allocation2 + $0x14] sm:$0xf0]  ;;  %v2750_v36 = vld [vmem:[#allocation2 + $0x84] sm:$0xf] }
  0x24   : > { %2265 = vmatmul.msk.bf16.gmra.mxu1 %vm374_vm0, %v2725_v19  ;;  %845 = vmatpush.bf16.msrb.mxu0 %v2303_v37  ;;  %v2757_v19 = vld [vmem:[#allocation2 + $0xb4] sm:$0xf0]  ;;  %v2346_v32 = vld [vmem:[#allocation2 + $0x90] sm:$0xf]  ;;  %v2340_v37 = vld [vmem:[#allocation2 + $0x88] sm:$0xf0] }
  0x25   : > { %894 = vmatpush.bf16.msrb.mxu1 %v2367_v39  ;;  %745 = vmatpush.bf16.msra.mxu2 %v2315_v3  ;;  %v2363_v20 = vor.u32 %v2757_v19, %v2362_v16  ;;  %v2753_v34 = vld [vmem:[#allocation2 + $0x94] sm:$0xf0]  ;;  %v2274_v38 = vld [vmem:[#allocation2] sm:$0xf]  ;;  %v2343_v39 = vor.u32 %v2750_v36, %v2340_v37  ;;  %v2751_v42 = vld [vmem:[#allocation2 + $0x84] sm:$0xf0] }
  0x26   : > { %794 = vmatpush.bf16.msra.mxu3 %v2379_v4  ;;  %v2347_v35 = vor.u32 %v2753_v34, %v2346_v32  ;;  %v2338_v41 = vld [vmem:[#allocation2 + $0x80] sm:$0xf]  ;;  %v2731_v45 = vld [vmem:[%s3019_s14 + $0x38] sm:$0xff]  ;;  %v2459_v51 = vld [vmem:[#allocation2 + $0x170] sm:$0xf] }
  0x27   : > { %v318_v46 = vld [vmem:[%s3302_s2] sm:$0x3]  ;;  %v2781_v52 = vld [vmem:[#allocation2 + $0x174] sm:$0xf0]  ;;  %v2523_v54 = vld [vmem:[#allocation2 + $0x1f0] sm:$0xf] }
  0x28   : > { %846 = vmatpush.bf16.msrb.mxu0 %v2295_v44  ;;  %v2339_v44 = vor.u32 %v2751_v42, %v2338_v41  ;;  %v3060_v49 = vperm.slane %v318_v46, 0  ;;  %v3062_v50 = vperm.slane %v318_v46, 1  ;;  %v2797_v55 = vld [vmem:[#allocation2 + $0x1f4] sm:$0xf0]  ;;  %v2780_v3 = vld [vmem:[#allocation2 + $0x174] sm:$0xf] }
  0x29   : > { %895 = vmatpush.bf16.msrb.mxu1 %v2359_v48  ;;  %746 = vmatpush.bf16.msra.mxu2 %v2307_v12  ;;  %v2524_v56 = vor.u32 %v2797_v55, %v2523_v54  ;;  %v2461_v4 = vld [vmem:[#allocation2 + $0x178] sm:$0xf0]  ;;  %v2796_v7 = vld [vmem:[#allocation2 + $0x1f4] sm:$0xf]  ;;  %v2779_v14 = vld [vmem:[#allocation2 + $0x164] sm:$0xf0] }
  0x2a   : > { %795 = vmatpush.bf16.msra.mxu3 %v2371_v13  ;;  %v2464_v6 = vor.u32 %v2780_v3, %v2461_v4  ;;  %v2451_v13 = vld [vmem:[#allocation2 + $0x160] sm:$0xf]  ;;  %v2517_v34 = vld [vmem:[#allocation2 + $0x1e8] sm:$0xf0]  ;;  %v2507_v42 = vld [vmem:[#allocation2 + $0x1d0] sm:$0xf] }
  0x2b   : > { %v2452_v15 = vor.u32 %v2779_v14, %v2451_v13  ;;  %v2515_v16 = vld [vmem:[#allocation2 + $0x1e0] sm:$0xf]  ;;  %v2775_v4 = vld [vmem:[#allocation2 + $0x144] sm:$0xf0] }
  0x2c   : > { %847 = vmatpush.bf16.msrb.mxu0 %v2287_v63  ;;  %v2435_v3 = vld [vmem:[#allocation2 + $0x140] sm:$0xf] }
  0x2d   : > { %896 = vmatpush.bf16.msrb.mxu1 %v2351_v8  ;;  %747 = vmatpush.bf16.msra.mxu2 %v2299_v18  ;;  %v2525_v8 = vld [vmem:[#allocation2 + $0x1f8] sm:$0xf0] }
  0x2e   : > { %796 = vmatpush.bf16.msra.mxu3 %v2363_v20  ;;  %v2528_v10 = vor.u32 %v2796_v7, %v2525_v8  ;;  %v2791_v7 = vld [vmem:[#allocation2 + $0x1c4] sm:$0xf0] }
  0x30   : > { %848 = vmatpush.bf16.msrb.mxu0 %v2279_v29  ;;  %v2778_v29 = vld [vmem:[#allocation2 + $0x164] sm:$0xf] }
  0x31   : > { %748 = vmatpush.bf16.msra.mxu2 %v2291_v23  ;;  %897 = vmatpush.bf16.msrb.mxu1 %v2343_v39  ;;  %v2443_v39 = vld [vmem:[#allocation2 + $0x150] sm:$0xf] }
  0x33   : > { %2258 = vmatmul.msk.bf16.gmra.mxu0 %vm374_vm0, %v2726_v26 }
  0x34   : > { %2266 = vmatmul.msk.bf16.gmra.mxu1 %vm374_vm0, %v2726_v26  ;;  %v2355_v26 = vor.u32 %v2755_v25, %v2354_v24  ;;  %1285 = vmatpush.bf16.msra.mxu0 %v2464_v6  ;;  %v2499_v6 = vld [vmem:[#allocation2 + $0x1c0] sm:$0xf] }
  0x35   : > { %1334 = vmatpush.bf16.msra.mxu1 %v2528_v10  ;;  %v2500_v8 = vor.u32 %v2791_v7, %v2499_v6 }
  0x36   : > { %797 = vmatpush.bf16.msra.mxu3 %v2355_v26 }
  0x3a   : > { %798 = vmatpush.bf16.msra.mxu3 %v2347_v35 }
  0x3e   : > { %799 = vmatpush.bf16.msra.mxu3 %v2339_v44 }
  0x42   : > { %1236 = vmatpush.bf16.msrb.mxu3 %v2524_v56 }
  0x43   : > { %2259 = vmatmul.msk.bf16.gmra.mxu0 %vm374_vm0, %v2727_v33 }
  0x44   : > { %2267 = vmatmul.msk.bf16.gmra.mxu1 %vm374_vm0, %v2727_v33  ;;  %v2283_v33 = vor.u32 %v2737_v31, %v2282_v30  ;;  %v2453_v30 = vld [vmem:[#allocation2 + $0x168] sm:$0xf0] }
  0x45   : > { %v2456_v32 = vor.u32 %v2778_v29, %v2453_v30  ;;  %v2427_v29 = vld [vmem:[#allocation2 + $0x130] sm:$0xf]  ;;  %v2773_v30 = vld [vmem:[#allocation2 + $0x134] sm:$0xf0] }
  0x46   : > { %749 = vmatpush.bf16.msra.mxu2 %v2283_v33  ;;  %v2794_v33 = vld [vmem:[#allocation2 + $0x1e4] sm:$0xf] }
  0x47   : > { %v2520_v36 = vor.u32 %v2794_v33, %v2517_v34  ;;  %1286 = vmatpush.bf16.msra.mxu0 %v2456_v32  ;;  %v2491_v32 = vld [vmem:[#allocation2 + $0x1b0] sm:$0xf]  ;;  %v2789_v33 = vld [vmem:[#allocation2 + $0x1b4] sm:$0xf0] }
  0x48   : > { %v2492_v34 = vor.u32 %v2789_v33, %v2491_v32 }
  0x49   : > { %1335 = vmatpush.bf16.msra.mxu1 %v2520_v36 }
  0x53   : > { %2260 = vmatmul.msk.bf16.gmra.mxu0 %vm374_vm0, %v2728_v40 }
  0x54   : > { %2268 = vmatmul.msk.bf16.gmra.mxu1 %vm374_vm0, %v2728_v40  ;;  %v2735_v40 = vld [vmem:[#allocation2 + $0x4] sm:$0xf0] }
  0x55   : > { %v2275_v43 = vor.u32 %v2735_v40, %v2274_v38  ;;  %v2777_v40 = vld [vmem:[#allocation2 + $0x154] sm:$0xf0] }
  0x56   : > { %v2444_v41 = vor.u32 %v2777_v40, %v2443_v39 }
  0x57   : > { %750 = vmatpush.bf16.msra.mxu2 %v2275_v43  ;;  %v2793_v43 = vld [vmem:[#allocation2 + $0x1d4] sm:$0xf0] }
  0x58   : > { %v2508_v44 = vor.u32 %v2793_v43, %v2507_v42 }
  0x63   : > { %2261 = vmatmul.msk.bf16.gmra.mxu0 %vm374_vm0, %v2729_v53 }
  0x64   : > { %2269 = vmatmul.msk.bf16.gmra.mxu1 %vm374_vm0, %v2729_v53  ;;  %v2460_v53 = vor.u32 %v2781_v52, %v2459_v51 }
  0x66   : > { %1187 = vmatpush.bf16.msrb.mxu2 %v2460_v53 }
  0x6a   : > { %1188 = vmatpush.bf16.msrb.mxu2 %v2452_v15 }
  0x6e   : > { %1189 = vmatpush.bf16.msrb.mxu2 %v2444_v41 }
  0x73   : > { %2262 = vmatmul.msk.bf16.gmra.mxu0 %vm374_vm0, %v2730_v17 }
  0x74   : > { %2270 = vmatmul.msk.bf16.gmra.mxu1 %vm374_vm0, %v2730_v17  ;;  %v2795_v17 = vld [vmem:[#allocation2 + $0x1e4] sm:$0xf0] }
  0x75   : > { %v2516_v18 = vor.u32 %v2795_v17, %v2515_v16 }
  0x77   : > { %1237 = vmatpush.bf16.msrb.mxu3 %v2516_v18 }
  0x7b   : > { %1238 = vmatpush.bf16.msrb.mxu3 %v2508_v44 }
  0x7f   : > { %1239 = vmatpush.bf16.msrb.mxu3 %v2500_v8 }
  0x83   : > { %2263 = vmatmul.msk.bf16.gmra.mxu0 %vm374_vm0, %v2731_v45  ;;  %1240 = vmatpush.bf16.msrb.mxu3 %v2492_v34 }
  0x84   : > { %2271 = vmatmul.msk.bf16.gmra.mxu1 %vm374_vm0, %v2731_v45 }
  0x90   : > { %v408_v47 = vpop.f32.mrf.mxu0 }
  0x91   : > { %v457_v48 = vpop.f32.mrf.mxu1  ;;  %v409_v57 = vadd.f32 %v408_v47, %v3060_v49 }
  0x92   : > { %v458_v58 = vadd.f32 %v457_v48, %v3062_v50 }
  0x93   : > { %v497_v63 = vmax.f32 %v409_v57, 0.0  ;;  %v2776_v57 = vld [vmem:[#allocation2 + $0x154] sm:$0xf] }
  0x94   : > { %v498_v1 = vmax.f32 %v458_v58, 0.0  ;;  %v2445_v58 = vld [vmem:[#allocation2 + $0x158] sm:$0xf0] }
  0x98   : > { %v410_v59 = vpop.f32.mrf.mxu0 }
  0x99   : > { %v411_v60 = vadd.f32 %v410_v59, %v3060_v49  ;;  %v459_v61 = vpop.f32.mrf.mxu1 }
  0x9a   : > { %v460_v62 = vadd.f32 %v459_v61, %v3062_v50  ;;  %v2792_v61 = vld [vmem:[#allocation2 + $0x1d4] sm:$0xf] }
  0x9b   : > { %v499_v0 = vmax.f32 %v411_v60, 0.0  ;;  %v2448_v60 = vor.u32 %v2776_v57, %v2445_v58  ;;  %v2419_v57 = vld [vmem:[#allocation2 + $0x120] sm:$0xf]  ;;  %v2771_v58 = vld [vmem:[#allocation2 + $0x124] sm:$0xf0] }
  0x9c   : > { %v500_v2 = vmax.f32 %v460_v62, 0.0  ;;  %v2509_v62 = vld [vmem:[#allocation2 + $0x1d8] sm:$0xf0] }
  0x9d   : > { %v529_v5 = vpack.c.bf16 %v499_v0, %v497_v63  ;;  %v2512_v0 = vor.u32 %v2792_v61, %v2509_v62  ;;  %1287 = vmatpush.bf16.msra.mxu0 %v2448_v60  ;;  %v2483_v60 = vld [vmem:[#allocation2 + $0x1a0] sm:$0xf]  ;;  %v2787_v61 = vld [vmem:[#allocation2 + $0x1a4] sm:$0xf0] }
  0x9e   : > { %v530_v9 = vpack.c.bf16 %v500_v2, %v498_v1  ;;  %v2484_v62 = vor.u32 %v2787_v61, %v2483_v60 }
  0x9f   : > { %751 = vmatmul.bf16.vlgmr.msra.gmra.mxu2 %v529_v5  ;;  %849 = vmatmul.bf16.vlgmr.msrb.gmra.mxu0 %v529_v5  ;;  %v2436_v5 = vor.u32 %v2775_v4, %v2435_v3 }
  0xa0   : > { %800 = vmatmul.bf16.vlgmr.msra.gmra.mxu3 %v530_v9  ;;  %898 = vmatmul.bf16.vlgmr.msrb.gmra.mxu1 %v530_v9  ;;  %v413_v11 = vpop.f32.mrf.mxu0 }
  0xa1   : > { %v462_v12 = vpop.f32.mrf.mxu1  ;;  %v414_v19 = vadd.f32 %v413_v11, %v3060_v49  ;;  %1336 = vmatpush.bf16.msra.mxu1 %v2512_v0  ;;  %1190 = vmatpush.bf16.msrb.mxu2 %v2436_v5 }
  0xa2   : > { %v463_v20 = vadd.f32 %v462_v12, %v3062_v50  ;;  %1241 = vmatpush.bf16.msrb.mxu3 %v2484_v62 }
  0xa3   : > { %v501_v25 = vmax.f32 %v414_v19, 0.0  ;;  %v2774_v19 = vld [vmem:[#allocation2 + $0x144] sm:$0xf] }
  0xa4   : > { %v502_v27 = vmax.f32 %v463_v20, 0.0  ;;  %v2437_v20 = vld [vmem:[#allocation2 + $0x148] sm:$0xf0] }
  0xa8   : > { %v415_v21 = vpop.f32.mrf.mxu0 }
  0xa9   : > { %v416_v22 = vadd.f32 %v415_v21, %v3060_v49  ;;  %v464_v23 = vpop.f32.mrf.mxu1 }
  0xaa   : > { %v465_v24 = vadd.f32 %v464_v23, %v3062_v50  ;;  %v2790_v23 = vld [vmem:[#allocation2 + $0x1c4] sm:$0xf] }
  0xab   : > { %v503_v26 = vmax.f32 %v416_v22, 0.0  ;;  %v2440_v22 = vor.u32 %v2774_v19, %v2437_v20  ;;  %v2769_v19 = vld [vmem:[#allocation2 + $0x114] sm:$0xf0]  ;;  %v2475_v20 = vld [vmem:[#allocation2 + $0x190] sm:$0xf] }
  0xac   : > { %v504_v28 = vmax.f32 %v465_v24, 0.0  ;;  %v2501_v24 = vld [vmem:[#allocation2 + $0x1c8] sm:$0xf0] }
  0xad   : > { %v531_v31 = vpack.c.bf16 %v503_v26, %v501_v25  ;;  %v2504_v26 = vor.u32 %v2790_v23, %v2501_v24  ;;  %1288 = vmatpush.bf16.msra.mxu0 %v2440_v22  ;;  %v2785_v23 = vld [vmem:[#allocation2 + $0x194] sm:$0xf0]  ;;  %v2768_v24 = vld [vmem:[#allocation2 + $0x114] sm:$0xf] }
  0xae   : > { %v532_v35 = vpack.c.bf16 %v504_v28, %v502_v27 }
  0xaf   : > { %756 = vmatmul.bf16.gmra.mxu2 %v531_v31  ;;  %854 = vmatmul.bf16.gmra.mxu0 %v531_v31  ;;  %v2428_v31 = vor.u32 %v2773_v30, %v2427_v29 }
  0xb0   : > { %805 = vmatmul.bf16.gmra.mxu3 %v532_v35  ;;  %903 = vmatmul.bf16.gmra.mxu1 %v532_v35  ;;  %v418_v37 = vpop.f32.mrf.mxu0 }
  0xb1   : > { %v467_v38 = vpop.f32.mrf.mxu1  ;;  %v419_v45 = vadd.f32 %v418_v37, %v3060_v49  ;;  %1337 = vmatpush.bf16.msra.mxu1 %v2504_v26  ;;  %1191 = vmatpush.bf16.msrb.mxu2 %v2428_v31  ;;  %v2476_v26 = vor.u32 %v2785_v23, %v2475_v20 }
  0xb2   : > { %v468_v46 = vadd.f32 %v467_v38, %v3062_v50 }
  0xb3   : > { %v505_v53 = vmax.f32 %v419_v45, 0.0  ;;  %v2772_v45 = vld [vmem:[#allocation2 + $0x134] sm:$0xf]  ;;  %1242 = vmatpush.bf16.msrb.mxu3 %v2476_v26  ;;  %v2829_v26 = vld [vmem:[#allocation2 + $0x2f4] sm:$0xf0] }
  0xb4   : > { %v506_v55 = vmax.f32 %v468_v46, 0.0  ;;  %v2429_v46 = vld [vmem:[#allocation2 + $0x138] sm:$0xf0] }
  0xb8   : > { %v420_v47 = vpop.f32.mrf.mxu0 }
  0xb9   : > { %v421_v48 = vadd.f32 %v420_v47, %v3060_v49  ;;  %v469_v51 = vpop.f32.mrf.mxu1 }
  0xba   : > { %v470_v52 = vadd.f32 %v469_v51, %v3062_v50  ;;  %v2788_v51 = vld [vmem:[#allocation2 + $0x1b4] sm:$0xf] }
  0xbb   : > { %v507_v54 = vmax.f32 %v421_v48, 0.0  ;;  %v2432_v48 = vor.u32 %v2772_v45, %v2429_v46  ;;  %v2403_v46 = vld [vmem:[#allocation2 + $0x100] sm:$0xf] }
  0xbc   : > { %v508_v56 = vmax.f32 %v470_v52, 0.0  ;;  %v2493_v52 = vld [vmem:[#allocation2 + $0x1b8] sm:$0xf0] }
  0xbd   : > { %v533_v59 = vpack.c.bf16 %v507_v54, %v505_v53  ;;  %v2496_v54 = vor.u32 %v2788_v51, %v2493_v52  ;;  %1289 = vmatpush.bf16.msra.mxu0 %v2432_v48 }
  0xbe   : > { %v534_v63 = vpack.c.bf16 %v508_v56, %v506_v55 }
  0xbf   : > { %761 = vmatmul.bf16.gmra.mxu2 %v533_v59  ;;  %859 = vmatmul.bf16.gmra.mxu0 %v533_v59  ;;  %v2420_v59 = vor.u32 %v2771_v58, %v2419_v57 }
  0xc0   : > { %810 = vmatmul.bf16.gmra.mxu3 %v534_v63  ;;  %908 = vmatmul.bf16.gmra.mxu1 %v534_v63  ;;  %v423_v1 = vpop.f32.mrf.mxu0 }
  0xc1   : > { %v472_v2 = vpop.f32.mrf.mxu1  ;;  %v424_v9 = vadd.f32 %v423_v1, %v3060_v49  ;;  %1338 = vmatpush.bf16.msra.mxu1 %v2496_v54  ;;  %1192 = vmatpush.bf16.msrb.mxu2 %v2420_v59  ;;  %v2783_v54 = vld [vmem:[#allocation2 + $0x184] sm:$0xf0]  ;;  %v2469_v59 = vld [vmem:[#allocation2 + $0x188] sm:$0xf0] }
  0xc2   : > { %v473_v10 = vadd.f32 %v472_v2, %v3062_v50 }
  0xc3   : > { %v509_v15 = vmax.f32 %v424_v9, 0.0  ;;  %v2770_v9 = vld [vmem:[#allocation2 + $0x124] sm:$0xf] }
  0xc4   : > { %v510_v17 = vmax.f32 %v473_v10, 0.0  ;;  %v2421_v10 = vld [vmem:[#allocation2 + $0x128] sm:$0xf0] }
  0xc8   : > { %v425_v11 = vpop.f32.mrf.mxu0 }
  0xc9   : > { %v426_v12 = vadd.f32 %v425_v11, %v3060_v49  ;;  %v474_v13 = vpop.f32.mrf.mxu1 }
  0xca   : > { %v475_v14 = vadd.f32 %v474_v13, %v3062_v50  ;;  %v2786_v13 = vld [vmem:[#allocation2 + $0x1a4] sm:$0xf] }
  0xcb   : > { %v511_v16 = vmax.f32 %v426_v12, 0.0  ;;  %v2424_v12 = vor.u32 %v2770_v9, %v2421_v10 }
  0xcc   : > { %v512_v18 = vmax.f32 %v475_v14, 0.0  ;;  %v2485_v14 = vld [vmem:[#allocation2 + $0x1a8] sm:$0xf0] }
  0xcd   : > { %v535_v21 = vpack.c.bf16 %v511_v16, %v509_v15  ;;  %v2488_v16 = vor.u32 %v2786_v13, %v2485_v14  ;;  %1290 = vmatpush.bf16.msra.mxu0 %v2424_v12 }
  0xce   : > { %v536_v25 = vpack.c.bf16 %v512_v18, %v510_v17  ;;  %v2411_v18 = vld [vmem:[#allocation2 + $0x110] sm:$0xf] }
  0xcf   : > { %766 = vmatmul.bf16.gmra.mxu2 %v535_v21  ;;  %864 = vmatmul.bf16.gmra.mxu0 %v535_v21  ;;  %v2412_v22 = vor.u32 %v2769_v19, %v2411_v18 }
  0xd0   : > { %815 = vmatmul.bf16.gmra.mxu3 %v536_v25  ;;  %913 = vmatmul.bf16.gmra.mxu1 %v536_v25  ;;  %v428_v27 = vpop.f32.mrf.mxu0  ;;  %v2413_v25 = vld [vmem:[#allocation2 + $0x118] sm:$0xf0] }
  0xd1   : > { %v477_v28 = vpop.f32.mrf.mxu1  ;;  %v429_v35 = vadd.f32 %v428_v27, %v3060_v49  ;;  %1339 = vmatpush.bf16.msra.mxu1 %v2488_v16  ;;  %v2416_v27 = vor.u32 %v2768_v24, %v2413_v25  ;;  %1193 = vmatpush.bf16.msrb.mxu2 %v2412_v22  ;;  %v2813_v22 = vld [vmem:[#allocation2 + $0x274] sm:$0xf0]  ;;  %v2652_v25 = vld [vmem:[#allocation2 + $0x2f0] sm:$0xf] }
  0xd2   : > { %v478_v36 = vadd.f32 %v477_v28, %v3062_v50 }
  0xd3   : > { %v513_v41 = vmax.f32 %v429_v35, 0.0  ;;  %1291 = vmatpush.bf16.msra.mxu0 %v2416_v27 }
  0xd4   : > { %v514_v43 = vmax.f32 %v478_v36, 0.0 }
  0xd8   : > { %v430_v37 = vpop.f32.mrf.mxu0 }
  0xd9   : > { %v431_v38 = vadd.f32 %v430_v37, %v3060_v49  ;;  %v479_v39 = vpop.f32.mrf.mxu1 }
  0xda   : > { %v480_v40 = vadd.f32 %v479_v39, %v3062_v50 }
  0xdb   : > { %v515_v42 = vmax.f32 %v431_v38, 0.0 }
  0xdc   : > { %v516_v44 = vmax.f32 %v480_v40, 0.0 }
  0xdd   : > { %v537_v47 = vpack.c.bf16 %v515_v42, %v513_v41  ;;  %v2784_v42 = vld [vmem:[#allocation2 + $0x194] sm:$0xf] }
  0xde   : > { %v538_v53 = vpack.c.bf16 %v516_v44, %v514_v43  ;;  %v2477_v43 = vld [vmem:[#allocation2 + $0x198] sm:$0xf0] }
  0xdf   : > { %771 = vmatmul.bf16.gmra.mxu2 %v537_v47  ;;  %869 = vmatmul.bf16.gmra.mxu0 %v537_v47  ;;  %v2480_v44 = vor.u32 %v2784_v42, %v2477_v43  ;;  %v2767_v47 = vld [vmem:[#allocation2 + $0x104] sm:$0xf0]  ;;  %v2828_v43 = vld [vmem:[#allocation2 + $0x2f4] sm:$0xf] }
  0xe0   : > { %820 = vmatmul.bf16.gmra.mxu3 %v538_v53  ;;  %918 = vmatmul.bf16.gmra.mxu1 %v538_v53  ;;  %v433_v55 = vpop.f32.mrf.mxu0  ;;  %v2404_v52 = vor.u32 %v2767_v47, %v2403_v46  ;;  %v2467_v53 = vld [vmem:[#allocation2 + $0x180] sm:$0xf] }
  0xe1   : > { %v482_v56 = vpop.f32.mrf.mxu1  ;;  %v434_v63 = vadd.f32 %v433_v55, %v3060_v49  ;;  %1340 = vmatpush.bf16.msra.mxu1 %v2480_v44  ;;  %v2782_v55 = vld [vmem:[#allocation2 + $0x184] sm:$0xf]  ;;  %v2468_v58 = vor.u32 %v2783_v54, %v2467_v53  ;;  %v2654_v44 = vld [vmem:[#allocation2 + $0x2f8] sm:$0xf0] }
  0xe2   : > { %v483_v0 = vadd.f32 %v482_v56, %v3062_v50  ;;  %1194 = vmatpush.bf16.msrb.mxu2 %v2404_v52  ;;  %v2472_v61 = vor.u32 %v2782_v55, %v2469_v59  ;;  %v2657_v46 = vor.u32 %v2828_v43, %v2654_v44 }
  0xe3   : > { %v517_v5 = vmax.f32 %v434_v63, 0.0  ;;  %1243 = vmatpush.bf16.msrb.mxu3 %v2468_v58  ;;  %v2811_v58 = vld [vmem:[#allocation2 + $0x264] sm:$0xf0] }
  0xe4   : > { %v518_v7 = vmax.f32 %v483_v0, 0.0 }
  0xe5   : > { %1341 = vmatpush.bf16.msra.mxu1 %v2472_v61  ;;  %v2644_v61 = vld [vmem:[#allocation2 + $0x2e0] sm:$0xf] }
  0xe8   : > { %v435_v1 = vpop.f32.mrf.mxu0 }
  0xe9   : > { %v436_v2 = vadd.f32 %v435_v1, %v3060_v49  ;;  %v484_v3 = vpop.f32.mrf.mxu1  ;;  %1778 = vmatpush.bf16.msrb.mxu1 %v2657_v46  ;;  %v2574_v46 = vld [vmem:[#allocation2 + $0x258] sm:$0xf0] }
  0xea   : > { %v485_v4 = vadd.f32 %v484_v3, %v3062_v50 }
  0xeb   : > { %v519_v6 = vmax.f32 %v436_v2, 0.0 }
  0xec   : > { %v520_v8 = vmax.f32 %v485_v4, 0.0  ;;  %v2766_v4 = vld [vmem:[#allocation2 + $0x104] sm:$0xf] }
  0xed   : > { %v539_v11 = vpack.c.bf16 %v519_v6, %v517_v5  ;;  %v2405_v5 = vld [vmem:[#allocation2 + $0x108] sm:$0xf0] }
  0xee   : > { %v540_v15 = vpack.c.bf16 %v520_v8, %v518_v7 }
  0xef   : > { %776 = vmatmul.bf16.gmra.mxu2 %v539_v11  ;;  %874 = vmatmul.bf16.gmra.mxu0 %v539_v11 }
  0xf0   : > { %825 = vmatmul.bf16.gmra.mxu3 %v540_v15  ;;  %923 = vmatmul.bf16.gmra.mxu1 %v540_v15  ;;  %v438_v17 = vpop.f32.mrf.mxu0 }
  0xf1   : > { %v487_v21 = vpop.f32.mrf.mxu1  ;;  %v439_v28 = vadd.f32 %v438_v17, %v3060_v49 }
  0xf2   : > { %v488_v29 = vadd.f32 %v487_v21, %v3062_v50  ;;  %v2588_v21 = vld [vmem:[#allocation2 + $0x270] sm:$0xf] }
  0xf3   : > { %v521_v34 = vmax.f32 %v439_v28, 0.0  ;;  %v2589_v24 = vor.u32 %v2813_v22, %v2588_v21 }
  0xf4   : > { %v522_v36 = vmax.f32 %v488_v29, 0.0 }
  0xf5   : > { %1631 = vmatpush.bf16.msra.mxu2 %v2589_v24 }
  0xf8   : > { %v440_v30 = vpop.f32.mrf.mxu0 }
  0xf9   : > { %v441_v31 = vadd.f32 %v440_v30, %v3060_v49  ;;  %v489_v32 = vpop.f32.mrf.mxu1 }
  0xfa   : > { %v490_v33 = vadd.f32 %v489_v32, %v3062_v50 }
  0xfb   : > { %v523_v35 = vmax.f32 %v441_v31, 0.0  ;;  %v2653_v31 = vor.u32 %v2829_v26, %v2652_v25 }
  0xfc   : > { %v524_v37 = vmax.f32 %v490_v33, 0.0 }
  0xfd   : > { %v541_v38 = vpack.c.bf16 %v523_v35, %v521_v34  ;;  %1680 = vmatpush.bf16.msra.mxu3 %v2653_v31  ;;  %v2636_v31 = vld [vmem:[#allocation2 + $0x2d0] sm:$0xf] }
  0xfe   : > { %v542_v39 = vpack.c.bf16 %v524_v37, %v522_v36 }
  0xff   : > { %781 = vmatmul.bf16.gmra.mxu2 %v541_v38  ;;  %879 = vmatmul.bf16.gmra.mxu0 %v541_v38 }
 0x100   : > { %830 = vmatmul.bf16.gmra.mxu3 %v542_v39  ;;  %928 = vmatmul.bf16.gmra.mxu1 %v542_v39  ;;  %v443_v40 = vpop.f32.mrf.mxu0  ;;  %v2812_v39 = vld [vmem:[#allocation2 + $0x274] sm:$0xf] }
 0x101   : > { %v492_v41 = vpop.f32.mrf.mxu1  ;;  %v444_v45 = vadd.f32 %v443_v40, %v3060_v49  ;;  %v2590_v40 = vld [vmem:[#allocation2 + $0x278] sm:$0xf0] }
 0x102   : > { %v493_v48 = vadd.f32 %v492_v41, %v3062_v50  ;;  %v2593_v42 = vor.u32 %v2812_v39, %v2590_v40 }
 0x103   : > { %v525_v62 = vmax.f32 %v444_v45, 0.0 }
 0x104   : > { %v526_v0 = vmax.f32 %v493_v48, 0.0 }
 0x108   : > { %v445_v51 = vpop.f32.mrf.mxu0 }
 0x109   : > { %v446_v56 = vadd.f32 %v445_v51, %v3060_v49  ;;  %v494_v57 = vpop.f32.mrf.mxu1  ;;  %v2408_v49 = vor.u32 %v2766_v4, %v2405_v5 }
 0x10a   : > { %v495_v60 = vadd.f32 %v494_v57, %v3062_v50  ;;  %v577_v50 = vld [vmem:[%s3304_s4] sm:$0x3] }
 0x10b   : > { %v527_v63 = vmax.f32 %v446_v56, 0.0  ;;  %1292 = vmatpush.bf16.msra.mxu0 %v2408_v49  ;;  %v3099_v7 = vperm.slane %v577_v50, 1  ;;  %v3102_v11 = vperm.slane %v577_v50, 0  ;;  %v2580_v57 = vld [vmem:[#allocation2 + $0x260] sm:$0xf] }
 0x10c   : > { %v528_v1 = vmax.f32 %v495_v60, 0.0  ;;  %v2581_v60 = vor.u32 %v2811_v58, %v2580_v57 }
 0x10d   : > { %v543_v2 = vpack.c.bf16 %v527_v63, %v525_v62  ;;  %v2827_v62 = vld [vmem:[#allocation2 + $0x2e4] sm:$0xf0] }
 0x10e   : > { %v544_v3 = vpack.c.bf16 %v528_v1, %v526_v0  ;;  %1632 = vmatpush.bf16.msra.mxu2 %v2581_v60 }
 0x10f   : > { %786 = vmatmul.bf16.gmra.mxu2 %v543_v2  ;;  %884 = vmatmul.bf16.gmra.mxu0 %v543_v2 }
 0x110   : > { %835 = vmatmul.bf16.gmra.mxu3 %v544_v3  ;;  %933 = vmatmul.bf16.gmra.mxu1 %v544_v3  ;;  %v2645_v3 = vor.u32 %v2827_v62, %v2644_v61 }
 0x111   : > { %1729 = vmatpush.bf16.msrb.mxu0 %v2593_v42 }
 0x112   : > { %1681 = vmatpush.bf16.msra.mxu3 %v2645_v3  ;;  %v2628_v3 = vld [vmem:[#allocation2 + $0x2c0] sm:$0xf] }
 0x11c   : > { %v850_v6 = vpop.f32.mrf.mxu0 }
 0x11d   : > { %v899_v8 = vpop.f32.mrf.mxu1  ;;  %v851_v9 = vadd.f32 %v850_v6, %v3099_v7 }
 0x11f   : > { %v900_v14 = vadd.f32 %v899_v8, %v851_v9 }
 0x121   : > { %v940_v19 = vmax.f32 %v900_v14, 0.0 }
 0x122   : > { %v752_v10 = vpop.f32.mrf.mxu2 }
 0x123   : > { %v801_v12 = vpop.f32.mrf.mxu3  ;;  %v753_v17 = vadd.f32 %v752_v10, %v3102_v11  ;;  %v2810_v10 = vld [vmem:[#allocation2 + $0x264] sm:$0xf] }
 0x124   : > { %v852_v13 = vpop.f32.mrf.mxu0 }
 0x125   : > { %v853_v15 = vadd.f32 %v852_v13, %v3099_v7  ;;  %v901_v16 = vpop.f32.mrf.mxu1  ;;  %v802_v27 = vadd.f32 %v801_v12, %v753_v17  ;;  %v2582_v12 = vld [vmem:[#allocation2 + $0x268] sm:$0xf0] }
 0x126   : > { %v2585_v14 = vor.u32 %v2810_v10, %v2582_v12 }
 0x127   : > { %v902_v18 = vadd.f32 %v901_v16, %v853_v15  ;;  %v939_v35 = vmax.f32 %v802_v27, 0.0  ;;  %v2826_v15 = vld [vmem:[#allocation2 + $0x2e4] sm:$0xf]  ;;  %v2646_v16 = vld [vmem:[#allocation2 + $0x2e8] sm:$0xf0] }
 0x128   : > { %1730 = vmatpush.bf16.msrb.mxu0 %v2585_v14  ;;  %v2572_v27 = vld [vmem:[#allocation2 + $0x250] sm:$0xf] }
 0x129   : > { %v942_v20 = vmax.f32 %v902_v18, 0.0  ;;  %v2649_v18 = vor.u32 %v2826_v15, %v2646_v16 }
 0x12a   : > { %v754_v23 = vpop.f32.mrf.mxu2 }
 0x12b   : > { %v755_v28 = vadd.f32 %v754_v23, %v3102_v11  ;;  %v803_v29 = vpop.f32.mrf.mxu3  ;;  %v972_v30 = vpack.c.bf16 %v942_v20, %v940_v19  ;;  %1779 = vmatpush.bf16.msrb.mxu1 %v2649_v18  ;;  %v2566_v18 = vld [vmem:[#allocation2 + $0x248] sm:$0xf0] }
 0x12c   : > { %v855_v32 = vpop.f32.mrf.mxu0 }
 0x12d   : > { %v804_v33 = vadd.f32 %v803_v29, %v755_v28  ;;  %v904_v34 = vpop.f32.mrf.mxu1  ;;  %1244 = vmatmul.bf16.vlgmr.msrb.gmra.mxu3 %v972_v30  ;;  %1342 = vmatmul.bf16.vlgmr.msra.gmra.mxu1 %v972_v30  ;;  %v856_v37 = vadd.f32 %v855_v32, %v3099_v7  ;;  %v2809_v28 = vld [vmem:[#allocation2 + $0x254] sm:$0xf0] }
 0x12e   : > { %v2573_v30 = vor.u32 %v2809_v28, %v2572_v27  ;;  %v2825_v32 = vld [vmem:[#allocation2 + $0x2d4] sm:$0xf0] }
 0x12f   : > { %v941_v36 = vmax.f32 %v804_v33, 0.0  ;;  %v905_v48 = vadd.f32 %v904_v34, %v856_v37  ;;  %v2637_v37 = vor.u32 %v2825_v32, %v2636_v31 }
 0x130   : > { %1633 = vmatpush.bf16.msra.mxu2 %v2573_v30 }
 0x131   : > { %v971_v38 = vpack.c.bf16 %v941_v36, %v939_v35  ;;  %v944_v55 = vmax.f32 %v905_v48, 0.0  ;;  %1682 = vmatpush.bf16.msra.mxu3 %v2637_v37  ;;  %v2620_v37 = vld [vmem:[#allocation2 + $0x2b0] sm:$0xf] }
 0x132   : > { %v757_v41 = vpop.f32.mrf.mxu2 }
 0x133   : > { %v806_v45 = vpop.f32.mrf.mxu3  ;;  %1195 = vmatmul.bf16.vlgmr.msrb.gmra.mxu2 %v971_v38  ;;  %1293 = vmatmul.bf16.vlgmr.msra.gmra.mxu0 %v971_v38  ;;  %v758_v53 = vadd.f32 %v757_v41, %v3102_v11 }
 0x134   : > { %v857_v47 = vpop.f32.mrf.mxu0 }
 0x135   : > { %v858_v51 = vadd.f32 %v857_v47, %v3099_v7  ;;  %v906_v52 = vpop.f32.mrf.mxu1  ;;  %v807_v63 = vadd.f32 %v806_v45, %v758_v53  ;;  %v2808_v45 = vld [vmem:[#allocation2 + $0x254] sm:$0xf] }
 0x136   : > { %v2577_v48 = vor.u32 %v2808_v45, %v2574_v46 }
 0x137   : > { %v907_v54 = vadd.f32 %v906_v52, %v858_v51  ;;  %v943_v50 = vmax.f32 %v807_v63, 0.0  ;;  %v2824_v51 = vld [vmem:[#allocation2 + $0x2d4] sm:$0xf]  ;;  %v2638_v52 = vld [vmem:[#allocation2 + $0x2d8] sm:$0xf0] }
 0x138   : > { %1731 = vmatpush.bf16.msrb.mxu0 %v2577_v48  ;;  %v2564_v63 = vld [vmem:[#allocation2 + $0x240] sm:$0xf] }
 0x139   : > { %v946_v56 = vmax.f32 %v907_v54, 0.0  ;;  %v2641_v54 = vor.u32 %v2824_v51, %v2638_v52 }
 0x13a   : > { %v759_v59 = vpop.f32.mrf.mxu2 }
 0x13b   : > { %v760_v0 = vadd.f32 %v759_v59, %v3102_v11  ;;  %v808_v1 = vpop.f32.mrf.mxu3  ;;  %v974_v2 = vpack.c.bf16 %v946_v56, %v944_v55  ;;  %1780 = vmatpush.bf16.msrb.mxu1 %v2641_v54  ;;  %v2558_v54 = vld [vmem:[#allocation2 + $0x238] sm:$0xf0] }
 0x13c   : > { %v860_v4 = vpop.f32.mrf.mxu0 }
 0x13d   : > { %v809_v5 = vadd.f32 %v808_v1, %v760_v0  ;;  %v909_v49 = vpop.f32.mrf.mxu1  ;;  %1249 = vmatmul.bf16.gmra.mxu3 %v974_v2  ;;  %1347 = vmatmul.bf16.gmra.mxu1 %v974_v2  ;;  %v861_v8 = vadd.f32 %v860_v4, %v3099_v7  ;;  %v2807_v0 = vld [vmem:[#allocation2 + $0x244] sm:$0xf0] }
 0x13e   : > { %v2565_v2 = vor.u32 %v2807_v0, %v2564_v63  ;;  %v2823_v4 = vld [vmem:[#allocation2 + $0x2c4] sm:$0xf0] }
 0x13f   : > { %v945_v6 = vmax.f32 %v809_v5, 0.0  ;;  %v910_v20 = vadd.f32 %v909_v49, %v861_v8  ;;  %v2629_v8 = vor.u32 %v2823_v4, %v2628_v3 }
 0x140   : > { %1634 = vmatpush.bf16.msra.mxu2 %v2565_v2 }
 0x141   : > { %v973_v9 = vpack.c.bf16 %v945_v6, %v943_v50  ;;  %v948_v25 = vmax.f32 %v910_v20, 0.0  ;;  %1683 = vmatpush.bf16.msra.mxu3 %v2629_v8  ;;  %v2612_v8 = vld [vmem:[#allocation2 + $0x2a0] sm:$0xf] }
 0x142   : > { %v762_v13 = vpop.f32.mrf.mxu2 }
 0x143   : > { %v811_v17 = vpop.f32.mrf.mxu3  ;;  %1200 = vmatmul.bf16.gmra.mxu2 %v973_v9  ;;  %1298 = vmatmul.bf16.gmra.mxu0 %v973_v9  ;;  %v763_v23 = vadd.f32 %v762_v13, %v3102_v11 }
 0x144   : > { %v862_v19 = vpop.f32.mrf.mxu0 }
 0x145   : > { %v863_v21 = vadd.f32 %v862_v19, %v3099_v7  ;;  %v911_v22 = vpop.f32.mrf.mxu1  ;;  %v812_v33 = vadd.f32 %v811_v17, %v763_v23  ;;  %v2806_v17 = vld [vmem:[#allocation2 + $0x244] sm:$0xf] }
 0x146   : > { %v2569_v20 = vor.u32 %v2806_v17, %v2566_v18 }
 0x147   : > { %v912_v24 = vadd.f32 %v911_v22, %v863_v21  ;;  %v947_v41 = vmax.f32 %v812_v33, 0.0  ;;  %v2822_v21 = vld [vmem:[#allocation2 + $0x2c4] sm:$0xf]  ;;  %v2630_v22 = vld [vmem:[#allocation2 + $0x2c8] sm:$0xf0] }
 0x148   : > { %1732 = vmatpush.bf16.msrb.mxu0 %v2569_v20  ;;  %v2556_v33 = vld [vmem:[#allocation2 + $0x230] sm:$0xf] }
 0x149   : > { %v950_v26 = vmax.f32 %v912_v24, 0.0  ;;  %v2633_v24 = vor.u32 %v2822_v21, %v2630_v22  ;;  %v2802_v21 = vld [vmem:[#allocation2 + $0x224] sm:$0xf]  ;;  %v2550_v22 = vld [vmem:[#allocation2 + $0x228] sm:$0xf0] }
 0x14a   : > { %v764_v29 = vpop.f32.mrf.mxu2 }
 0x14b   : > { %v765_v34 = vadd.f32 %v764_v29, %v3102_v11  ;;  %v813_v35 = vpop.f32.mrf.mxu3  ;;  %v976_v36 = vpack.c.bf16 %v950_v26, %v948_v25  ;;  %1781 = vmatpush.bf16.msrb.mxu1 %v2633_v24  ;;  %v2818_v24 = vld [vmem:[#allocation2 + $0x2a4] sm:$0xf] }
 0x14c   : > { %v865_v38 = vpop.f32.mrf.mxu0 }
 0x14d   : > { %v814_v39 = vadd.f32 %v813_v35, %v765_v34  ;;  %v914_v40 = vpop.f32.mrf.mxu1  ;;  %1254 = vmatmul.bf16.gmra.mxu3 %v976_v36  ;;  %1352 = vmatmul.bf16.gmra.mxu1 %v976_v36  ;;  %v866_v43 = vadd.f32 %v865_v38, %v3099_v7  ;;  %v2805_v34 = vld [vmem:[#allocation2 + $0x234] sm:$0xf0] }
 0x14e   : > { %v2557_v36 = vor.u32 %v2805_v34, %v2556_v33  ;;  %v2821_v38 = vld [vmem:[#allocation2 + $0x2b4] sm:$0xf0]  ;;  %v2604_v33 = vld [vmem:[#allocation2 + $0x290] sm:$0xf] }
 0x14f   : > { %v949_v42 = vmax.f32 %v814_v39, 0.0  ;;  %v915_v56 = vadd.f32 %v914_v40, %v866_v43  ;;  %v2621_v43 = vor.u32 %v2821_v38, %v2620_v37 }
 0x150   : > { %1635 = vmatpush.bf16.msra.mxu2 %v2557_v36  ;;  %v2817_v36 = vld [vmem:[#allocation2 + $0x294] sm:$0xf0] }
 0x151   : > { %v975_v44 = vpack.c.bf16 %v949_v42, %v947_v41  ;;  %v952_v61 = vmax.f32 %v915_v56, 0.0  ;;  %1684 = vmatpush.bf16.msra.mxu3 %v2621_v43 }
 0x152   : > { %v767_v47 = vpop.f32.mrf.mxu2 }
 0x153   : > { %v816_v53 = vpop.f32.mrf.mxu3  ;;  %1205 = vmatmul.bf16.gmra.mxu2 %v975_v44  ;;  %1303 = vmatmul.bf16.gmra.mxu0 %v975_v44  ;;  %v768_v59 = vadd.f32 %v767_v47, %v3102_v11 }
 0x154   : > { %v867_v55 = vpop.f32.mrf.mxu0 }
 0x155   : > { %v868_v57 = vadd.f32 %v867_v55, %v3099_v7  ;;  %v916_v58 = vpop.f32.mrf.mxu1  ;;  %v817_v5 = vadd.f32 %v816_v53, %v768_v59  ;;  %v2804_v53 = vld [vmem:[#allocation2 + $0x234] sm:$0xf] }
 0x156   : > { %v2561_v56 = vor.u32 %v2804_v53, %v2558_v54 }
 0x157   : > { %v917_v60 = vadd.f32 %v916_v58, %v868_v57  ;;  %v951_v13 = vmax.f32 %v817_v5, 0.0  ;;  %v2820_v57 = vld [vmem:[#allocation2 + $0x2b4] sm:$0xf]  ;;  %v2622_v58 = vld [vmem:[#allocation2 + $0x2b8] sm:$0xf0] }
 0x158   : > { %1733 = vmatpush.bf16.msrb.mxu0 %v2561_v56  ;;  %v2548_v5 = vld [vmem:[#allocation2 + $0x220] sm:$0xf] }
 0x159   : > { %v954_v62 = vmax.f32 %v917_v60, 0.0  ;;  %v2625_v60 = vor.u32 %v2820_v57, %v2622_v58 }
 0x15a   : > { %v769_v1 = vpop.f32.mrf.mxu2 }
 0x15b   : > { %v770_v49 = vadd.f32 %v769_v1, %v3102_v11  ;;  %v818_v50 = vpop.f32.mrf.mxu3  ;;  %v978_v6 = vpack.c.bf16 %v954_v62, %v952_v61  ;;  %1782 = vmatpush.bf16.msrb.mxu1 %v2625_v60 }
 0x15c   : > { %v870_v9 = vpop.f32.mrf.mxu0 }
 0x15d   : > { %v819_v10 = vadd.f32 %v818_v50, %v770_v49  ;;  %v919_v12 = vpop.f32.mrf.mxu1  ;;  %1259 = vmatmul.bf16.gmra.mxu3 %v978_v6  ;;  %1357 = vmatmul.bf16.gmra.mxu1 %v978_v6  ;;  %v871_v15 = vadd.f32 %v870_v9, %v3099_v7  ;;  %v2803_v49 = vld [vmem:[#allocation2 + $0x224] sm:$0xf0] }
 0x15e   : > { %v2549_v6 = vor.u32 %v2803_v49, %v2548_v5  ;;  %v2819_v9 = vld [vmem:[#allocation2 + $0x2a4] sm:$0xf0] }
 0x15f   : > { %v953_v14 = vmax.f32 %v819_v10, 0.0  ;;  %v920_v26 = vadd.f32 %v919_v12, %v871_v15  ;;  %v2613_v15 = vor.u32 %v2819_v9, %v2612_v8 }
 0x160   : > { %1636 = vmatpush.bf16.msra.mxu2 %v2549_v6 }
 0x161   : > { %v977_v16 = vpack.c.bf16 %v953_v14, %v951_v13  ;;  %v956_v31 = vmax.f32 %v920_v26, 0.0  ;;  %1685 = vmatpush.bf16.msra.mxu3 %v2613_v15  ;;  %v2532_v15 = vld [vmem:[#allocation2 + $0x200] sm:$0xf] }
 0x162   : > { %v772_v19 = vpop.f32.mrf.mxu2 }
 0x163   : > { %v821_v23 = vpop.f32.mrf.mxu3  ;;  %1210 = vmatmul.bf16.gmra.mxu2 %v977_v16  ;;  %1308 = vmatmul.bf16.gmra.mxu0 %v977_v16  ;;  %v773_v29 = vadd.f32 %v772_v19, %v3102_v11 }
 0x164   : > { %v872_v25 = vpop.f32.mrf.mxu0 }
 0x165   : > { %v873_v27 = vadd.f32 %v872_v25, %v3099_v7  ;;  %v921_v28 = vpop.f32.mrf.mxu1  ;;  %v822_v39 = vadd.f32 %v821_v23, %v773_v29  ;;  %v2553_v23 = vor.u32 %v2802_v21, %v2550_v22  ;;  %v2614_v25 = vld [vmem:[#allocation2 + $0x2a8] sm:$0xf0] }
 0x167   : > { %v922_v30 = vadd.f32 %v921_v28, %v873_v27  ;;  %v955_v47 = vmax.f32 %v822_v39, 0.0  ;;  %v2617_v28 = vor.u32 %v2818_v24, %v2614_v25  ;;  %1734 = vmatpush.bf16.msrb.mxu0 %v2553_v23  ;;  %v2598_v23 = vld [vmem:[#allocation2 + $0x288] sm:$0xf0] }
 0x169   : > { %v958_v32 = vmax.f32 %v922_v30, 0.0  ;;  %1783 = vmatpush.bf16.msrb.mxu1 %v2617_v28  ;;  %v2534_v28 = vld [vmem:[#allocation2 + $0x208] sm:$0xf0] }
 0x16a   : > { %v774_v35 = vpop.f32.mrf.mxu2 }
 0x16b   : > { %v775_v40 = vadd.f32 %v774_v35, %v3102_v11  ;;  %v823_v41 = vpop.f32.mrf.mxu3  ;;  %v980_v42 = vpack.c.bf16 %v958_v32, %v956_v31  ;;  %v2540_v31 = vld [vmem:[#allocation2 + $0x210] sm:$0xf]  ;;  %v2801_v32 = vld [vmem:[#allocation2 + $0x214] sm:$0xf0] }
 0x16c   : > { %v875_v44 = vpop.f32.mrf.mxu0  ;;  %v2541_v35 = vor.u32 %v2801_v32, %v2540_v31  ;;  %v2400_v31 = vld [vmem:[%s3304_s4 + $0x2] sm:$0x3] }
 0x16d   : > { %v824_v45 = vadd.f32 %v823_v41, %v775_v40  ;;  %v924_v46 = vpop.f32.mrf.mxu1  ;;  %1264 = vmatmul.bf16.gmra.mxu3 %v980_v42  ;;  %1362 = vmatmul.bf16.gmra.mxu1 %v980_v42  ;;  %v876_v51 = vadd.f32 %v875_v44, %v3099_v7  ;;  %v2605_v40 = vor.u32 %v2817_v36, %v2604_v33 }
 0x16e   : > { %1637 = vmatpush.bf16.msra.mxu2 %v2541_v35 }
 0x16f   : > { %v957_v48 = vmax.f32 %v824_v45, 0.0  ;;  %v925_v62 = vadd.f32 %v924_v46, %v876_v51  ;;  %1686 = vmatpush.bf16.msra.mxu3 %v2605_v40  ;;  %v2800_v46 = vld [vmem:[#allocation2 + $0x214] sm:$0xf] }
 0x171   : > { %v979_v52 = vpack.c.bf16 %v957_v48, %v955_v47  ;;  %v960_v3 = vmax.f32 %v925_v62, 0.0  ;;  %v2542_v47 = vld [vmem:[#allocation2 + $0x218] sm:$0xf0] }
 0x172   : > { %v777_v55 = vpop.f32.mrf.mxu2  ;;  %v2545_v54 = vor.u32 %v2800_v46, %v2542_v47 }
 0x173   : > { %v826_v59 = vpop.f32.mrf.mxu3  ;;  %1215 = vmatmul.bf16.gmra.mxu2 %v979_v52  ;;  %1313 = vmatmul.bf16.gmra.mxu0 %v979_v52  ;;  %v778_v1 = vadd.f32 %v777_v55, %v3102_v11 }
 0x174   : > { %v877_v61 = vpop.f32.mrf.mxu0  ;;  %1735 = vmatpush.bf16.msrb.mxu0 %v2545_v54 }
 0x175   : > { %v878_v63 = vadd.f32 %v877_v61, %v3099_v7  ;;  %v926_v0 = vpop.f32.mrf.mxu1  ;;  %v827_v10 = vadd.f32 %v826_v59, %v778_v1 }
 0x177   : > { %v927_v2 = vadd.f32 %v926_v0, %v878_v63  ;;  %v959_v19 = vmax.f32 %v827_v10, 0.0 }
 0x179   : > { %v962_v4 = vmax.f32 %v927_v2, 0.0 }
 0x17a   : > { %v779_v50 = vpop.f32.mrf.mxu2 }
 0x17b   : > { %v780_v12 = vadd.f32 %v779_v50, %v3102_v11  ;;  %v828_v13 = vpop.f32.mrf.mxu3  ;;  %v982_v14 = vpack.c.bf16 %v962_v4, %v960_v3  ;;  %v2816_v3 = vld [vmem:[#allocation2 + $0x294] sm:$0xf]  ;;  %v2606_v4 = vld [vmem:[#allocation2 + $0x298] sm:$0xf0] }
 0x17c   : > { %v880_v16 = vpop.f32.mrf.mxu0  ;;  %v2609_v49 = vor.u32 %v2816_v3, %v2606_v4 }
 0x17d   : > { %v829_v17 = vadd.f32 %v828_v13, %v780_v12  ;;  %v929_v18 = vpop.f32.mrf.mxu1  ;;  %1269 = vmatmul.bf16.gmra.mxu3 %v982_v14  ;;  %1367 = vmatmul.bf16.gmra.mxu1 %v982_v14  ;;  %v881_v26 = vadd.f32 %v880_v16, %v3099_v7  ;;  %v2799_v16 = vld [vmem:[#allocation2 + $0x204] sm:$0xf0] }
 0x17e   : > { %1784 = vmatpush.bf16.msrb.mxu1 %v2609_v49 }
 0x17f   : > { %v961_v20 = vmax.f32 %v829_v17, 0.0  ;;  %v930_v37 = vadd.f32 %v929_v18, %v881_v26  ;;  %v2533_v18 = vor.u32 %v2799_v16, %v2532_v15 }
 0x181   : > { %v981_v27 = vpack.c.bf16 %v961_v20, %v959_v19  ;;  %v964_v43 = vmax.f32 %v930_v37, 0.0  ;;  %v2815_v19 = vld [vmem:[#allocation2 + $0x284] sm:$0xf0]  ;;  %v2814_v20 = vld [vmem:[#allocation2 + $0x284] sm:$0xf]  ;;  %1638 = vmatpush.bf16.msra.mxu2 %v2533_v18 }
 0x182   : > { %v782_v29 = vpop.f32.mrf.mxu2  ;;  %v2601_v24 = vor.u32 %v2814_v20, %v2598_v23 }
 0x183   : > { %v831_v30 = vpop.f32.mrf.mxu3  ;;  %1220 = vmatmul.bf16.gmra.mxu2 %v981_v27  ;;  %1318 = vmatmul.bf16.gmra.mxu0 %v981_v27  ;;  %v783_v41 = vadd.f32 %v782_v29, %v3102_v11  ;;  %v2798_v27 = vld [vmem:[#allocation2 + $0x204] sm:$0xf] }
 0x184   : > { %v882_v34 = vpop.f32.mrf.mxu0  ;;  %1785 = vmatpush.bf16.msrb.mxu1 %v2601_v24  ;;  %v2537_v29 = vor.u32 %v2798_v27, %v2534_v28 }
 0x185   : > { %v883_v38 = vadd.f32 %v882_v34, %v3099_v7  ;;  %v931_v39 = vpop.f32.mrf.mxu1  ;;  %v832_v48 = vadd.f32 %v831_v30, %v783_v41  ;;  %v3138_v34 = vperm.slane %v2400_v31, 1 }
 0x186   : > { %1736 = vmatpush.bf16.msrb.mxu0 %v2537_v29 }
 0x187   : > { %v932_v42 = vadd.f32 %v931_v39, %v883_v38  ;;  %v963_v58 = vmax.f32 %v832_v48, 0.0  ;;  %v3141_v38 = vperm.slane %v2400_v31, 0  ;;  %v2837_v48 = vld [vmem:[%s3305_s5 + $0x38] sm:$0xff] }
 0x188   : > { %2007 = vmatpush.bf16.msrb.mxu2 %v2837_v48 }
 0x189   : > { %v966_v44 = vmax.f32 %v932_v42, 0.0 }
 0x18a   : > { %v784_v45 = vpop.f32.mrf.mxu2 }
 0x18b   : > { %v785_v51 = vadd.f32 %v784_v45, %v3102_v11  ;;  %v833_v52 = vpop.f32.mrf.mxu3  ;;  %v984_v53 = vpack.c.bf16 %v966_v44, %v964_v43 }
 0x18c   : > { %v885_v55 = vpop.f32.mrf.mxu0 }
 0x18d   : > { %v834_v56 = vadd.f32 %v833_v52, %v785_v51  ;;  %v934_v57 = vpop.f32.mrf.mxu1  ;;  %1274 = vmatmul.bf16.gmra.mxu3 %v984_v53  ;;  %1372 = vmatmul.bf16.gmra.mxu1 %v984_v53  ;;  %v886_v60 = vadd.f32 %v885_v55, %v3099_v7  ;;  %v2845_v51 = vld [vmem:[%s3305_s5 + $0x78] sm:$0xff] }
 0x18f   : > { %v965_v59 = vmax.f32 %v834_v56, 0.0  ;;  %v935_v1 = vadd.f32 %v934_v57, %v886_v60 }
 0x191   : > { %v983_v61 = vpack.c.bf16 %v965_v59, %v963_v58  ;;  %v968_v8 = vmax.f32 %v935_v1, 0.0 }
 0x192   : > { %v787_v62 = vpop.f32.mrf.mxu2 }
 0x193   : > { %v836_v63 = vpop.f32.mrf.mxu3  ;;  %1225 = vmatmul.bf16.gmra.mxu2 %v983_v61  ;;  %1323 = vmatmul.bf16.gmra.mxu0 %v983_v61  ;;  %v788_v50 = vadd.f32 %v787_v62, %v3102_v11 }
 0x194   : > { %v887_v0 = vpop.f32.mrf.mxu0 }
 0x195   : > { %v888_v2 = vadd.f32 %v887_v0, %v3099_v7  ;;  %v936_v5 = vpop.f32.mrf.mxu1  ;;  %v837_v12 = vadd.f32 %v836_v63, %v788_v50  ;;  %v2596_v7 = vld [vmem:[#allocation2 + $0x280] sm:$0xf] }
 0x196   : > { %v2597_v22 = vor.u32 %v2815_v19, %v2596_v7 }
 0x197   : > { %v937_v6 = vadd.f32 %v936_v5, %v888_v2  ;;  %v967_v25 = vmax.f32 %v837_v12, 0.0 }
 0x198   : > { %1687 = vmatpush.bf16.msra.mxu3 %v2597_v22 }
 0x199   : > { %v970_v9 = vmax.f32 %v937_v6, 0.0 }
 0x19a   : > { %v789_v10 = vpop.f32.mrf.mxu2 }
 0x19b   : > { %v790_v13 = vadd.f32 %v789_v10, %v3102_v11  ;;  %v986_v14 = vpack.c.bf16 %v970_v9, %v968_v8  ;;  %v838_v17 = vpop.f32.mrf.mxu3  ;;  %v2836_v9 = vld [vmem:[%s3305_s5 + $0x30] sm:$0xff] }
 0x19c   : > { %2056 = vmatpush.bf16.msrb.mxu3 %v2845_v51  ;;  %v2844_v10 = vld [vmem:[%s3305_s5 + $0x70] sm:$0xff]  ;;  %2008 = vmatpush.bf16.msrb.mxu2 %v2836_v9 }
 0x19d   : > { %v839_v21 = vadd.f32 %v838_v17, %v790_v13  ;;  %1279 = vmatmul.bf16.gmra.mxu3 %v986_v14  ;;  %1377 = vmatmul.bf16.gmra.mxu1 %v986_v14 }
 0x19f   : > { %v969_v26 = vmax.f32 %v839_v21, 0.0 }
 0x1a0   : > { %2057 = vmatpush.bf16.msrb.mxu3 %v2844_v10 }
 0x1a1   : > { %v985_v11 = vpack.c.bf16 %v969_v26, %v967_v25 }
 0x1a3   : > { %1230 = vmatmul.bf16.gmra.mxu2 %v985_v11  ;;  %1328 = vmatmul.bf16.gmra.mxu0 %v985_v11 }
 0x1aa   : > { %v1343_v30 = vpop.f32.mrf.mxu1 }
 0x1b0   : > { %v1245_v32 = vpop.f32.mrf.mxu3  ;;  %v1294_v33 = vpop.f32.mrf.mxu0 }
 0x1b1   : > { %v1295_v36 = vadd.f32 %v1294_v33, %v3138_v34  ;;  %v2843_v33 = vld [vmem:[%s3305_s5 + $0x68] sm:$0xff] }
 0x1b2   : > { %v1345_v35 = vpop.f32.mrf.mxu1  ;;  %2058 = vmatpush.bf16.msrb.mxu3 %v2843_v33 }
 0x1b3   : > { %v1344_v41 = vadd.f32 %v1343_v30, %v1295_v36 }
 0x1b5   : > { %v1384_v46 = vmax.f32 %v1344_v41, 0.0 }
 0x1b6   : > { %v1196_v37 = vpop.f32.mrf.mxu2 }
 0x1b7   : > { %v1197_v44 = vadd.f32 %v1196_v37, %v3141_v38 }
 0x1b8   : > { %v1247_v39 = vpop.f32.mrf.mxu3  ;;  %v1296_v40 = vpop.f32.mrf.mxu0 }
 0x1b9   : > { %v1297_v42 = vadd.f32 %v1296_v40, %v3138_v34  ;;  %v1246_v53 = vadd.f32 %v1245_v32, %v1197_v44  ;;  %v2835_v32 = vld [vmem:[%s3305_s5 + $0x28] sm:$0xff] }
 0x1ba   : > { %v1348_v43 = vpop.f32.mrf.mxu1  ;;  %2009 = vmatpush.bf16.msrb.mxu2 %v2835_v32 }
 0x1bb   : > { %v1346_v45 = vadd.f32 %v1345_v35, %v1297_v42  ;;  %v1383_v60 = vmax.f32 %v1246_v53, 0.0 }
 0x1bd   : > { %v1386_v47 = vmax.f32 %v1346_v45, 0.0 }
 0x1be   : > { %v1198_v52 = vpop.f32.mrf.mxu2 }
 0x1bf   : > { %v1416_v54 = vpack.c.bf16 %v1386_v47, %v1384_v46  ;;  %v1199_v55 = vadd.f32 %v1198_v52, %v3141_v38 }
 0x1c0   : > { %v1250_v56 = vpop.f32.mrf.mxu3  ;;  %v1299_v57 = vpop.f32.mrf.mxu0 }
 0x1c1   : > { %v1248_v58 = vadd.f32 %v1247_v39, %v1199_v55  ;;  %1688 = vmatmul.bf16.vlgmr.msra.gmra.mxu3 %v1416_v54  ;;  %1786 = vmatmul.bf16.vlgmr.msrb.gmra.mxu1 %v1416_v54  ;;  %v1300_v63 = vadd.f32 %v1299_v57, %v3138_v34 }
 0x1c2   : > { %v1350_v59 = vpop.f32.mrf.mxu1 }
 0x1c3   : > { %v1385_v61 = vmax.f32 %v1248_v58, 0.0  ;;  %v1349_v3 = vadd.f32 %v1348_v43, %v1300_v63 }
 0x1c5   : > { %v1415_v62 = vpack.c.bf16 %v1385_v61, %v1383_v60  ;;  %v1388_v6 = vmax.f32 %v1349_v3, 0.0  ;;  %v2834_v60 = vld [vmem:[%s3305_s5 + $0x20] sm:$0xff] }
 0x1c6   : > { %v1201_v0 = vpop.f32.mrf.mxu2  ;;  %v2842_v61 = vld [vmem:[%s3305_s5 + $0x60] sm:$0xff]  ;;  %2010 = vmatpush.bf16.msrb.mxu2 %v2834_v60 }
 0x1c7   : > { %1639 = vmatmul.bf16.vlgmr.msra.gmra.mxu2 %v1415_v62  ;;  %1737 = vmatmul.bf16.vlgmr.msrb.gmra.mxu0 %v1415_v62  ;;  %v1202_v49 = vadd.f32 %v1201_v0, %v3141_v38 }
 0x1c8   : > { %v1252_v1 = vpop.f32.mrf.mxu3  ;;  %v1301_v2 = vpop.f32.mrf.mxu0  ;;  %2059 = vmatpush.bf16.msrb.mxu3 %v2842_v61  ;;  %v2831_v61 = vld [vmem:[%s3305_s5 + $0x8] sm:$0xff] }
 0x1c9   : > { %v1302_v4 = vadd.f32 %v1301_v2, %v3138_v34  ;;  %v1251_v13 = vadd.f32 %v1250_v56, %v1202_v49 }
 0x1ca   : > { %v1353_v5 = vpop.f32.mrf.mxu1 }
 0x1cb   : > { %v1351_v50 = vadd.f32 %v1350_v59, %v1302_v4  ;;  %v1387_v19 = vmax.f32 %v1251_v13, 0.0 }
 0x1cd   : > { %v1390_v8 = vmax.f32 %v1351_v50, 0.0 }
 0x1ce   : > { %v1203_v12 = vpop.f32.mrf.mxu2 }
 0x1cf   : > { %v1204_v14 = vadd.f32 %v1203_v12, %v3141_v38  ;;  %v1418_v15 = vpack.c.bf16 %v1390_v8, %v1388_v6 }
 0x1d0   : > { %v1255_v16 = vpop.f32.mrf.mxu3  ;;  %v1304_v17 = vpop.f32.mrf.mxu0 }
 0x1d1   : > { %v1253_v18 = vadd.f32 %v1252_v1, %v1204_v14  ;;  %1693 = vmatmul.bf16.gmra.mxu3 %v1418_v15  ;;  %1791 = vmatmul.bf16.gmra.mxu1 %v1418_v15  ;;  %v1305_v21 = vadd.f32 %v1304_v17, %v3138_v34 }
 0x1d2   : > { %v1355_v7 = vpop.f32.mrf.mxu1 }
 0x1d3   : > { %v1389_v20 = vmax.f32 %v1253_v18, 0.0  ;;  %v1354_v26 = vadd.f32 %v1353_v5, %v1305_v21 }
 0x1d5   : > { %v1417_v22 = vpack.c.bf16 %v1389_v20, %v1387_v19  ;;  %v1392_v30 = vmax.f32 %v1354_v26, 0.0  ;;  %v2833_v19 = vld [vmem:[%s3305_s5 + $0x18] sm:$0xff] }
 0x1d6   : > { %v1206_v23 = vpop.f32.mrf.mxu2  ;;  %v2841_v20 = vld [vmem:[%s3305_s5 + $0x58] sm:$0xff]  ;;  %2011 = vmatpush.bf16.msrb.mxu2 %v2833_v19 }
 0x1d7   : > { %1644 = vmatmul.bf16.gmra.mxu2 %v1417_v22  ;;  %1742 = vmatmul.bf16.gmra.mxu0 %v1417_v22  ;;  %v1207_v28 = vadd.f32 %v1206_v23, %v3141_v38 }
 0x1d8   : > { %v1257_v24 = vpop.f32.mrf.mxu3  ;;  %v1306_v25 = vpop.f32.mrf.mxu0  ;;  %2060 = vmatpush.bf16.msrb.mxu3 %v2841_v20 }
 0x1d9   : > { %v1307_v11 = vadd.f32 %v1306_v25, %v3138_v34  ;;  %v1256_v36 = vadd.f32 %v1255_v16, %v1207_v28 }
 0x1da   : > { %v1358_v27 = vpop.f32.mrf.mxu1 }
 0x1db   : > { %v1356_v29 = vadd.f32 %v1355_v7, %v1307_v11  ;;  %v1391_v44 = vmax.f32 %v1256_v36, 0.0 }
 0x1dd   : > { %v1394_v31 = vmax.f32 %v1356_v29, 0.0 }
 0x1de   : > { %v1208_v35 = vpop.f32.mrf.mxu2 }
 0x1df   : > { %v1209_v37 = vadd.f32 %v1208_v35, %v3141_v38  ;;  %v1420_v39 = vpack.c.bf16 %v1394_v31, %v1392_v30 }
 0x1e0   : > { %v1260_v40 = vpop.f32.mrf.mxu3  ;;  %v1309_v41 = vpop.f32.mrf.mxu0 }
 0x1e1   : > { %v1258_v42 = vadd.f32 %v1257_v24, %v1209_v37  ;;  %1698 = vmatmul.bf16.gmra.mxu3 %v1420_v39  ;;  %1796 = vmatmul.bf16.gmra.mxu1 %v1420_v39  ;;  %v1310_v46 = vadd.f32 %v1309_v41, %v3138_v34 }
 0x1e2   : > { %v1360_v43 = vpop.f32.mrf.mxu1 }
 0x1e3   : > { %v1393_v45 = vmax.f32 %v1258_v42, 0.0  ;;  %v1359_v53 = vadd.f32 %v1358_v27, %v1310_v46 }
 0x1e5   : > { %v1419_v47 = vpack.c.bf16 %v1393_v45, %v1391_v44  ;;  %v1396_v58 = vmax.f32 %v1359_v53, 0.0  ;;  %v2832_v44 = vld [vmem:[%s3305_s5 + $0x10] sm:$0xff] }
 0x1e6   : > { %v1211_v48 = vpop.f32.mrf.mxu2  ;;  %v2840_v45 = vld [vmem:[%s3305_s5 + $0x50] sm:$0xff]  ;;  %2012 = vmatpush.bf16.msrb.mxu2 %v2832_v44 }
 0x1e7   : > { %1649 = vmatmul.bf16.gmra.mxu2 %v1419_v47  ;;  %1747 = vmatmul.bf16.gmra.mxu0 %v1419_v47  ;;  %v1212_v56 = vadd.f32 %v1211_v48, %v3141_v38 }
 0x1e8   : > { %v1262_v51 = vpop.f32.mrf.mxu3  ;;  %v1311_v52 = vpop.f32.mrf.mxu0  ;;  %2061 = vmatpush.bf16.msrb.mxu3 %v2840_v45 }
 0x1e9   : > { %v1312_v54 = vadd.f32 %v1311_v52, %v3138_v34  ;;  %v1261_v63 = vadd.f32 %v1260_v40, %v1212_v56 }
 0x1ea   : > { %v1363_v55 = vpop.f32.mrf.mxu1  ;;  %2013 = vmatpush.bf16.msrb.mxu2 %v2831_v61 }
 0x1eb   : > { %v1361_v57 = vadd.f32 %v1360_v43, %v1312_v54  ;;  %v1395_v49 = vmax.f32 %v1261_v63, 0.0 }
 0x1ed   : > { %v1398_v59 = vmax.f32 %v1361_v57, 0.0 }
 0x1ee   : > { %v1213_v62 = vpop.f32.mrf.mxu2 }
 0x1ef   : > { %v1214_v0 = vadd.f32 %v1213_v62, %v3141_v38  ;;  %v1422_v1 = vpack.c.bf16 %v1398_v59, %v1396_v58  ;;  %v2839_v62 = vld [vmem:[%s3305_s5 + $0x48] sm:$0xff] }
 0x1f0   : > { %v1265_v2 = vpop.f32.mrf.mxu3  ;;  %v1314_v3 = vpop.f32.mrf.mxu0  ;;  %2062 = vmatpush.bf16.msrb.mxu3 %v2839_v62 }
 0x1f1   : > { %v1263_v4 = vadd.f32 %v1262_v51, %v1214_v0  ;;  %1703 = vmatmul.bf16.gmra.mxu3 %v1422_v1  ;;  %1801 = vmatmul.bf16.gmra.mxu1 %v1422_v1  ;;  %v1315_v6 = vadd.f32 %v1314_v3, %v3138_v34 }
 0x1f2   : > { %v1365_v5 = vpop.f32.mrf.mxu1 }
 0x1f3   : > { %v1397_v50 = vmax.f32 %v1263_v4, 0.0  ;;  %v1364_v13 = vadd.f32 %v1363_v55, %v1315_v6 }
 0x1f5   : > { %v1421_v8 = vpack.c.bf16 %v1397_v50, %v1395_v49  ;;  %v1400_v18 = vmax.f32 %v1364_v13, 0.0 }
 0x1f6   : > { %v1216_v9 = vpop.f32.mrf.mxu2 }
 0x1f7   : > { %1654 = vmatmul.bf16.gmra.mxu2 %v1421_v8  ;;  %1752 = vmatmul.bf16.gmra.mxu0 %v1421_v8  ;;  %v1217_v16 = vadd.f32 %v1216_v9, %v3141_v38 }
 0x1f8   : > { %v1267_v10 = vpop.f32.mrf.mxu3  ;;  %v1316_v12 = vpop.f32.mrf.mxu0 }
 0x1f9   : > { %v1317_v14 = vadd.f32 %v1316_v12, %v3138_v34  ;;  %v1266_v22 = vadd.f32 %v1265_v2, %v1217_v16 }
 0x1fa   : > { %v1368_v15 = vpop.f32.mrf.mxu1 }
 0x1fb   : > { %v1366_v17 = vadd.f32 %v1365_v5, %v1317_v14  ;;  %v1399_v28 = vmax.f32 %v1266_v22, 0.0 }
 0x1fd   : > { %v1402_v7 = vmax.f32 %v1366_v17, 0.0 }
 0x1fe   : > { %v1218_v21 = vpop.f32.mrf.mxu2 }
 0x1ff   : > { %v1219_v23 = vadd.f32 %v1218_v21, %v3141_v38  ;;  %v1424_v24 = vpack.c.bf16 %v1402_v7, %v1400_v18 }
 0x200   : > { %v1270_v25 = vpop.f32.mrf.mxu3  ;;  %v1319_v26 = vpop.f32.mrf.mxu0 }
 0x201   : > { %v1268_v11 = vadd.f32 %v1267_v10, %v1219_v23  ;;  %1708 = vmatmul.bf16.gmra.mxu3 %v1424_v24  ;;  %1806 = vmatmul.bf16.gmra.mxu1 %v1424_v24  ;;  %v1320_v30 = vadd.f32 %v1319_v26, %v3138_v34 }
 0x202   : > { %v1370_v27 = vpop.f32.mrf.mxu1 }
 0x203   : > { %v1401_v29 = vmax.f32 %v1268_v11, 0.0  ;;  %v1369_v36 = vadd.f32 %v1368_v15, %v1320_v30  ;;  %v2830_v30 = vld [vmem:[%s3305_s5] sm:$0xff] }
 0x204   : > { %2014 = vmatpush.bf16.msrb.mxu2 %v2830_v30 }
 0x205   : > { %v1423_v31 = vpack.c.bf16 %v1401_v29, %v1399_v28  ;;  %v1404_v42 = vmax.f32 %v1369_v36, 0.0 }
 0x206   : > { %v1221_v32 = vpop.f32.mrf.mxu2 }
 0x207   : > { %1659 = vmatmul.bf16.gmra.mxu2 %v1423_v31  ;;  %1757 = vmatmul.bf16.gmra.mxu0 %v1423_v31  ;;  %v1222_v39 = vadd.f32 %v1221_v32, %v3141_v38 }
 0x208   : > { %v1272_v33 = vpop.f32.mrf.mxu3  ;;  %v1321_v35 = vpop.f32.mrf.mxu0 }
 0x209   : > { %v1322_v37 = vadd.f32 %v1321_v35, %v3138_v34  ;;  %v1271_v47 = vadd.f32 %v1270_v25, %v1222_v39 }
 0x20a   : > { %v1373_v41 = vpop.f32.mrf.mxu1 }
 0x20b   : > { %v1371_v40 = vadd.f32 %v1370_v27, %v1322_v37  ;;  %v1403_v55 = vmax.f32 %v1271_v47, 0.0  ;;  %v2529_v37 = vld [vmem:[%s3304_s4 + $0x4] sm:$0x3] }
 0x20c   : > { %v3228_v45 = vperm.slane %v2529_v37, 0 }
 0x20d   : > { %v1406_v43 = vmax.f32 %v1371_v40, 0.0 }
 0x20e   : > { %v1223_v46 = vpop.f32.mrf.mxu2 }
 0x20f   : > { %v1224_v48 = vadd.f32 %v1223_v46, %v3141_v38  ;;  %v1426_v51 = vpack.c.bf16 %v1406_v43, %v1404_v42 }
 0x210   : > { %v1324_v52 = vpop.f32.mrf.mxu0  ;;  %v1275_v54 = vpop.f32.mrf.mxu3 }
 0x211   : > { %v1273_v53 = vadd.f32 %v1272_v33, %v1224_v48  ;;  %1713 = vmatmul.bf16.gmra.mxu3 %v1426_v51  ;;  %1811 = vmatmul.bf16.gmra.mxu1 %v1426_v51  ;;  %v1325_v57 = vadd.f32 %v1324_v52, %v3138_v34 }
 0x212   : > { %v1375_v59 = vpop.f32.mrf.mxu1 }
 0x213   : > { %v1405_v56 = vmax.f32 %v1273_v53, 0.0  ;;  %v1374_v0 = vadd.f32 %v1373_v41, %v1325_v57  ;;  %v3225_v41 = vperm.slane %v2529_v37, 1 }
 0x215   : > { %v1425_v58 = vpack.c.bf16 %v1405_v56, %v1403_v55  ;;  %v1408_v5 = vmax.f32 %v1374_v0, 0.0 }
 0x216   : > { %v1226_v60 = vpop.f32.mrf.mxu2 }
 0x217   : > { %1664 = vmatmul.bf16.gmra.mxu2 %v1425_v58  ;;  %1762 = vmatmul.bf16.gmra.mxu0 %v1425_v58  ;;  %v1227_v2 = vadd.f32 %v1226_v60, %v3141_v38 }
 0x218   : > { %v1326_v63 = vpop.f32.mrf.mxu0  ;;  %v1277_v4 = vpop.f32.mrf.mxu3 }
 0x219   : > { %v1327_v1 = vadd.f32 %v1326_v63, %v3138_v34  ;;  %v1276_v6 = vadd.f32 %v1275_v54, %v1227_v2 }
 0x21a   : > { %v1378_v10 = vpop.f32.mrf.mxu1 }
 0x21b   : > { %v1376_v3 = vadd.f32 %v1375_v59, %v1327_v1  ;;  %v1407_v14 = vmax.f32 %v1276_v6, 0.0 }
 0x21d   : > { %v1410_v49 = vmax.f32 %v1376_v3, 0.0 }
 0x21e   : > { %v1228_v50 = vpop.f32.mrf.mxu2 }
 0x21f   : > { %v1229_v8 = vadd.f32 %v1228_v50, %v3141_v38  ;;  %v1428_v9 = vpack.c.bf16 %v1410_v49, %v1408_v5 }
 0x220   : > { %v1329_v12 = vpop.f32.mrf.mxu0  ;;  %v1280_v18 = vpop.f32.mrf.mxu3 }
 0x221   : > { %v1278_v13 = vadd.f32 %v1277_v4, %v1229_v8  ;;  %1718 = vmatmul.bf16.gmra.mxu3 %v1428_v9  ;;  %1816 = vmatmul.bf16.gmra.mxu1 %v1428_v9  ;;  %v1330_v16 = vadd.f32 %v1329_v12, %v3138_v34 }
 0x222   : > { %v1380_v22 = vpop.f32.mrf.mxu1 }
 0x223   : > { %v1409_v15 = vmax.f32 %v1278_v13, 0.0  ;;  %v1379_v20 = vadd.f32 %v1378_v10, %v1330_v16 }
 0x225   : > { %v1427_v17 = vpack.c.bf16 %v1409_v15, %v1407_v14  ;;  %v1412_v25 = vmax.f32 %v1379_v20, 0.0 }
 0x226   : > { %v1231_v7 = vpop.f32.mrf.mxu2 }
 0x227   : > { %1669 = vmatmul.bf16.gmra.mxu2 %v1427_v17  ;;  %1767 = vmatmul.bf16.gmra.mxu0 %v1427_v17  ;;  %v1232_v23 = vadd.f32 %v1231_v7, %v3141_v38 }
 0x228   : > { %v1331_v19 = vpop.f32.mrf.mxu0  ;;  %v1282_v31 = vpop.f32.mrf.mxu3 }
 0x229   : > { %v1332_v21 = vadd.f32 %v1331_v19, %v3138_v34  ;;  %v1281_v27 = vadd.f32 %v1280_v18, %v1232_v23  ;;  %v2838_v34 = vld [vmem:[%s3305_s5 + $0x40] sm:$0xff] }
 0x22a   : > { %2063 = vmatpush.bf16.msrb.mxu3 %v2838_v34 }
 0x22b   : > { %v1381_v24 = vadd.f32 %v1380_v22, %v1332_v21  ;;  %v1411_v33 = vmax.f32 %v1281_v27, 0.0 }
 0x22d   : > { %v1414_v26 = vmax.f32 %v1381_v24, 0.0 }
 0x22e   : > { %v1233_v11 = vpop.f32.mrf.mxu2 }
 0x22f   : > { %v1234_v28 = vadd.f32 %v1233_v11, %v3141_v38  ;;  %v1430_v29 = vpack.c.bf16 %v1414_v26, %v1412_v25 }
 0x231   : > { %v1283_v32 = vadd.f32 %v1282_v31, %v1234_v28  ;;  %1723 = vmatmul.bf16.gmra.mxu3 %v1430_v29  ;;  %1821 = vmatmul.bf16.gmra.mxu1 %v1430_v29 }
 0x233   : > { %v1413_v35 = vmax.f32 %v1283_v32, 0.0 }
 0x235   : > { %v1429_v36 = vpack.c.bf16 %v1413_v35, %v1411_v33 }
 0x237   : > { %1674 = vmatmul.bf16.gmra.mxu2 %v1429_v36  ;;  %1772 = vmatmul.bf16.gmra.mxu0 %v1429_v36 }
 0x23e   : > { %v1787_v38 = vpop.f32.mrf.mxu1 }
 0x244   : > { %v1689_v39 = vpop.f32.mrf.mxu3  ;;  %v1738_v40 = vpop.f32.mrf.mxu0 }
 0x245   : > { %v1739_v43 = vadd.f32 %v1738_v40, %v3225_v41 }
 0x246   : > { %v1789_v42 = vpop.f32.mrf.mxu1 }
 0x247   : > { %v1788_v48 = vadd.f32 %v1787_v38, %v1739_v43 }
 0x249   : > { %v1828_v55 = vmax.f32 %v1788_v48, 0.0 }
 0x24a   : > { %v1640_v44 = vpop.f32.mrf.mxu2 }
 0x24b   : > { %v1641_v53 = vadd.f32 %v1640_v44, %v3228_v45 }
 0x24c   : > { %v1691_v46 = vpop.f32.mrf.mxu3  ;;  %v1740_v47 = vpop.f32.mrf.mxu0 }
 0x24d   : > { %v1741_v51 = vadd.f32 %v1740_v47, %v3225_v41  ;;  %v1690_v58 = vadd.f32 %v1689_v39, %v1641_v53 }
 0x24e   : > { %v1792_v52 = vpop.f32.mrf.mxu1 }
 0x24f   : > { %v1790_v54 = vadd.f32 %v1789_v42, %v1741_v51  ;;  %v1827_v1 = vmax.f32 %v1690_v58, 0.0 }
 0x251   : > { %v1830_v56 = vmax.f32 %v1790_v54, 0.0 }
 0x252   : > { %v1642_v57 = vpop.f32.mrf.mxu2 }
 0x253   : > { %v1860_v59 = vpack.c.bf16 %v1830_v56, %v1828_v55  ;;  %v1643_v60 = vadd.f32 %v1642_v57, %v3228_v45 }
 0x254   : > { %v1694_v61 = vpop.f32.mrf.mxu3  ;;  %v1743_v62 = vpop.f32.mrf.mxu0 }
 0x255   : > { %v1692_v63 = vadd.f32 %v1691_v46, %v1643_v60  ;;  %2064 = vmatmul.bf16.vlgmr.msrb.gmra.mxu3 %v1860_v59  ;;  %v1744_v4 = vadd.f32 %v1743_v62, %v3225_v41 }
 0x256   : > { %v1794_v0 = vpop.f32.mrf.mxu1 }
 0x257   : > { %v1829_v2 = vmax.f32 %v1692_v63, 0.0  ;;  %v1793_v6 = vadd.f32 %v1792_v52, %v1744_v4 }
 0x259   : > { %v1859_v3 = vpack.c.bf16 %v1829_v2, %v1827_v1  ;;  %v1832_v13 = vmax.f32 %v1793_v6, 0.0 }
 0x25a   : > { %v1645_v5 = vpop.f32.mrf.mxu2 }
 0x25b   : > { %2015 = vmatmul.bf16.vlgmr.msrb.gmra.mxu2 %v1859_v3  ;;  %v1646_v10 = vadd.f32 %v1645_v5, %v3228_v45 }
 0x25c   : > { %v1696_v49 = vpop.f32.mrf.mxu3  ;;  %v1745_v50 = vpop.f32.mrf.mxu0 }
 0x25d   : > { %v1746_v8 = vadd.f32 %v1745_v50, %v3225_v41  ;;  %v1695_v16 = vadd.f32 %v1694_v61, %v1646_v10 }
 0x25e   : > { %v1797_v9 = vpop.f32.mrf.mxu1 }
 0x25f   : > { %v1795_v12 = vadd.f32 %v1794_v0, %v1746_v8  ;;  %v1831_v22 = vmax.f32 %v1695_v16, 0.0 }
 0x261   : > { %v1834_v14 = vmax.f32 %v1795_v12, 0.0 }
 0x262   : > { %v1647_v15 = vpop.f32.mrf.mxu2 }
 0x263   : > { %v1648_v17 = vadd.f32 %v1647_v15, %v3228_v45  ;;  %v1862_v18 = vpack.c.bf16 %v1834_v14, %v1832_v13 }
 0x264   : > { %v1699_v7 = vpop.f32.mrf.mxu3  ;;  %v1748_v19 = vpop.f32.mrf.mxu0 }
 0x265   : > { %v1697_v20 = vadd.f32 %v1696_v49, %v1648_v17  ;;  %2069 = vmatmul.bf16.gmra.mxu3 %v1862_v18  ;;  %v1749_v24 = vadd.f32 %v1748_v19, %v3225_v41 }
 0x266   : > { %v1799_v21 = vpop.f32.mrf.mxu1 }
 0x267   : > { %v1833_v23 = vmax.f32 %v1697_v20, 0.0  ;;  %v1798_v28 = vadd.f32 %v1797_v9, %v1749_v24 }
 0x269   : > { %v1861_v25 = vpack.c.bf16 %v1833_v23, %v1831_v22  ;;  %v1836_v34 = vmax.f32 %v1798_v28, 0.0 }
 0x26a   : > { %v1650_v26 = vpop.f32.mrf.mxu2 }
 0x26b   : > { %2020 = vmatmul.bf16.gmra.mxu2 %v1861_v25  ;;  %v1651_v31 = vadd.f32 %v1650_v26, %v3228_v45 }
 0x26c   : > { %v1701_v11 = vpop.f32.mrf.mxu3  ;;  %v1750_v27 = vpop.f32.mrf.mxu0 }
 0x26d   : > { %v1751_v29 = vadd.f32 %v1750_v27, %v3225_v41  ;;  %v1700_v36 = vadd.f32 %v1699_v7, %v1651_v31 }
 0x26e   : > { %v1802_v30 = vpop.f32.mrf.mxu1 }
 0x26f   : > { %v1800_v32 = vadd.f32 %v1799_v21, %v1751_v29  ;;  %v1835_v44 = vmax.f32 %v1700_v36, 0.0 }
 0x271   : > { %v1838_v33 = vmax.f32 %v1800_v32, 0.0 }
 0x272   : > { %v1652_v35 = vpop.f32.mrf.mxu2 }
 0x273   : > { %v1653_v38 = vadd.f32 %v1652_v35, %v3228_v45  ;;  %v1864_v37 = vpack.c.bf16 %v1838_v33, %v1836_v34 }
 0x274   : > { %v1704_v39 = vpop.f32.mrf.mxu3  ;;  %v1753_v40 = vpop.f32.mrf.mxu0 }
 0x275   : > { %v1702_v42 = vadd.f32 %v1701_v11, %v1653_v38  ;;  %2074 = vmatmul.bf16.gmra.mxu3 %v1864_v37  ;;  %v1754_v47 = vadd.f32 %v1753_v40, %v3225_v41 }
 0x276   : > { %v1804_v43 = vpop.f32.mrf.mxu1 }
 0x277   : > { %v1837_v46 = vmax.f32 %v1702_v42, 0.0  ;;  %v1803_v54 = vadd.f32 %v1802_v30, %v1754_v47 }
 0x279   : > { %v1863_v48 = vpack.c.bf16 %v1837_v46, %v1835_v44  ;;  %v1840_v59 = vmax.f32 %v1803_v54, 0.0 }
 0x27a   : > { %v1655_v51 = vpop.f32.mrf.mxu2 }
 0x27b   : > { %2025 = vmatmul.bf16.gmra.mxu2 %v1863_v48  ;;  %v1656_v57 = vadd.f32 %v1655_v51, %v3228_v45 }
 0x27c   : > { %v1706_v52 = vpop.f32.mrf.mxu3  ;;  %v1755_v53 = vpop.f32.mrf.mxu0 }
 0x27d   : > { %v1756_v55 = vadd.f32 %v1755_v53, %v3225_v41  ;;  %v1705_v62 = vadd.f32 %v1704_v39, %v1656_v57 }
 0x27e   : > { %v1807_v56 = vpop.f32.mrf.mxu1 }
 0x27f   : > { %v1805_v58 = vadd.f32 %v1804_v43, %v1756_v55  ;;  %v1839_v5 = vmax.f32 %v1705_v62, 0.0 }
 0x281   : > { %v1842_v60 = vmax.f32 %v1805_v58, 0.0 }
 0x282   : > { %v1657_v61 = vpop.f32.mrf.mxu2 }
 0x283   : > { %v1658_v63 = vadd.f32 %v1657_v61, %v3228_v45  ;;  %v1866_v0 = vpack.c.bf16 %v1842_v60, %v1840_v59 }
 0x284   : > { %v1709_v1 = vpop.f32.mrf.mxu3  ;;  %v1758_v2 = vpop.f32.mrf.mxu0 }
 0x285   : > { %v1707_v3 = vadd.f32 %v1706_v52, %v1658_v63  ;;  %2079 = vmatmul.bf16.gmra.mxu3 %v1866_v0  ;;  %v1759_v50 = vadd.f32 %v1758_v2, %v3225_v41 }
 0x286   : > { %v1809_v4 = vpop.f32.mrf.mxu1 }
 0x287   : > { %v1841_v49 = vmax.f32 %v1707_v3, 0.0  ;;  %v1808_v12 = vadd.f32 %v1807_v56, %v1759_v50 }
 0x289   : > { %v1865_v6 = vpack.c.bf16 %v1841_v49, %v1839_v5  ;;  %v1844_v17 = vmax.f32 %v1808_v12, 0.0 }
 0x28a   : > { %v1660_v8 = vpop.f32.mrf.mxu2 }
 0x28b   : > { %2030 = vmatmul.bf16.gmra.mxu2 %v1865_v6  ;;  %v1661_v15 = vadd.f32 %v1660_v8, %v3228_v45 }
 0x28c   : > { %v1711_v9 = vpop.f32.mrf.mxu3  ;;  %v1760_v10 = vpop.f32.mrf.mxu0 }
 0x28d   : > { %v1761_v13 = vadd.f32 %v1760_v10, %v3225_v41  ;;  %v1710_v19 = vadd.f32 %v1709_v1, %v1661_v15 }
 0x28e   : > { %v1812_v14 = vpop.f32.mrf.mxu1 }
 0x28f   : > { %v1810_v16 = vadd.f32 %v1809_v4, %v1761_v13  ;;  %v1843_v26 = vmax.f32 %v1710_v19, 0.0 }
 0x291   : > { %v1846_v18 = vmax.f32 %v1810_v16, 0.0 }
 0x292   : > { %v1662_v7 = vpop.f32.mrf.mxu2 }
 0x293   : > { %v1663_v20 = vadd.f32 %v1662_v7, %v3228_v45  ;;  %v1868_v21 = vpack.c.bf16 %v1846_v18, %v1844_v17 }
 0x294   : > { %v1714_v22 = vpop.f32.mrf.mxu3  ;;  %v1763_v23 = vpop.f32.mrf.mxu0 }
 0x295   : > { %v1712_v24 = vadd.f32 %v1711_v9, %v1663_v20  ;;  %2084 = vmatmul.bf16.gmra.mxu3 %v1868_v21  ;;  %v1764_v27 = vadd.f32 %v1763_v23, %v3225_v41 }
 0x296   : > { %v1814_v25 = vpop.f32.mrf.mxu1 }
 0x297   : > { %v1845_v11 = vmax.f32 %v1712_v24, 0.0  ;;  %v1813_v32 = vadd.f32 %v1812_v14, %v1764_v27 }
 0x299   : > { %v1867_v28 = vpack.c.bf16 %v1845_v11, %v1843_v26  ;;  %v1848_v38 = vmax.f32 %v1813_v32, 0.0 }
 0x29a   : > { %v1665_v29 = vpop.f32.mrf.mxu2 }
 0x29b   : > { %2035 = vmatmul.bf16.gmra.mxu2 %v1867_v28  ;;  %v1666_v33 = vadd.f32 %v1665_v29, %v3228_v45 }
 0x29c   : > { %v1716_v30 = vpop.f32.mrf.mxu3  ;;  %v1765_v31 = vpop.f32.mrf.mxu0 }
 0x29d   : > { %v1766_v34 = vadd.f32 %v1765_v31, %v3225_v41  ;;  %v1715_v40 = vadd.f32 %v1714_v22, %v1666_v33 }
 0x29e   : > { %v1817_v36 = vpop.f32.mrf.mxu1 }
 0x29f   : > { %v1815_v35 = vadd.f32 %v1814_v25, %v1766_v34  ;;  %v1847_v48 = vmax.f32 %v1715_v40, 0.0 }
 0x2a1   : > { %v1850_v37 = vmax.f32 %v1815_v35, 0.0 }
 0x2a2   : > { %v1667_v39 = vpop.f32.mrf.mxu2 }
 0x2a3   : > { %v1668_v42 = vadd.f32 %v1667_v39, %v3228_v45  ;;  %v1870_v43 = vpack.c.bf16 %v1850_v37, %v1848_v38 }
 0x2a4   : > { %v1768_v44 = vpop.f32.mrf.mxu0  ;;  %v1719_v47 = vpop.f32.mrf.mxu3 }
 0x2a5   : > { %v1717_v46 = vadd.f32 %v1716_v30, %v1668_v42  ;;  %2089 = vmatmul.bf16.gmra.mxu3 %v1870_v43  ;;  %v1769_v52 = vadd.f32 %v1768_v44, %v3225_v41  ;;  %v3264_v30 = vld [vmem:[%s3306_s6] ss:$0 sm:$0xff] }
 0x2a6   : > { %v1819_v54 = vpop.f32.mrf.mxu1 }
 0x2a7   : > { %v1849_v51 = vmax.f32 %v1717_v46, 0.0  ;;  %v1818_v57 = vadd.f32 %v1817_v36, %v1769_v52 }
 0x2a9   : > { %v1869_v53 = vpack.c.bf16 %v1849_v51, %v1847_v48  ;;  %v1852_v62 = vmax.f32 %v1818_v57, 0.0 }
 0x2aa   : > { %v1670_v55 = vpop.f32.mrf.mxu2 }
 0x2ab   : > { %2040 = vmatmul.bf16.gmra.mxu2 %v1869_v53  ;;  %v1671_v59 = vadd.f32 %v1670_v55, %v3228_v45 }
 0x2ac   : > { %v1770_v56 = vpop.f32.mrf.mxu0  ;;  %v1721_v61 = vpop.f32.mrf.mxu3 }
 0x2ad   : > { %v1771_v58 = vadd.f32 %v1770_v56, %v3225_v41  ;;  %v1720_v1 = vadd.f32 %v1719_v47, %v1671_v59 }
 0x2ae   : > { %v1822_v4 = vpop.f32.mrf.mxu1 }
 0x2af   : > { %v1820_v60 = vadd.f32 %v1819_v54, %v1771_v58  ;;  %v1851_v50 = vmax.f32 %v1720_v1, 0.0 }
 0x2b1   : > { %v1854_v63 = vmax.f32 %v1820_v60, 0.0 }
 0x2b2   : > { %v1672_v0 = vpop.f32.mrf.mxu2 }
 0x2b3   : > { %v1673_v2 = vadd.f32 %v1672_v0, %v3228_v45  ;;  %v1872_v3 = vpack.c.bf16 %v1854_v63, %v1852_v62 }
 0x2b4   : > { %v1773_v5 = vpop.f32.mrf.mxu0  ;;  %v1724_v10 = vpop.f32.mrf.mxu3 }
 0x2b5   : > { %v1722_v49 = vadd.f32 %v1721_v61, %v1673_v2  ;;  %2094 = vmatmul.bf16.gmra.mxu3 %v1872_v3  ;;  %v1774_v8 = vadd.f32 %v1773_v5, %v3225_v41 }
 0x2b6   : > { %v1824_v16 = vpop.f32.mrf.mxu1 }
 0x2b7   : > { %v1853_v6 = vmax.f32 %v1722_v49, 0.0  ;;  %v1823_v14 = vadd.f32 %v1822_v4, %v1774_v8 }
 0x2b9   : > { %v1871_v9 = vpack.c.bf16 %v1853_v6, %v1851_v50  ;;  %v1856_v7 = vmax.f32 %v1823_v14, 0.0 }
 0x2ba   : > { %v1675_v12 = vpop.f32.mrf.mxu2 }
 0x2bb   : > { %2045 = vmatmul.bf16.gmra.mxu2 %v1871_v9  ;;  %v1676_v17 = vadd.f32 %v1675_v12, %v3228_v45 }
 0x2bc   : > { %v1775_v13 = vpop.f32.mrf.mxu0  ;;  %v1726_v24 = vpop.f32.mrf.mxu3 }
 0x2bd   : > { %v1776_v15 = vadd.f32 %v1775_v13, %v3225_v41  ;;  %v1725_v21 = vadd.f32 %v1724_v10, %v1676_v17 }
 0x2bf   : > { %v1825_v18 = vadd.f32 %v1824_v16, %v1776_v15  ;;  %v1855_v26 = vmax.f32 %v1725_v21, 0.0 }
 0x2c1   : > { %v1858_v19 = vmax.f32 %v1825_v18, 0.0 }
 0x2c2   : > { %v1677_v20 = vpop.f32.mrf.mxu2 }
 0x2c3   : > { %v1678_v22 = vadd.f32 %v1677_v20, %v3228_v45  ;;  %v1874_v23 = vpack.c.bf16 %v1858_v19, %v1856_v7 }
 0x2c5   : > { %v1727_v25 = vadd.f32 %v1726_v24, %v1678_v22  ;;  %2099 = vmatmul.bf16.gmra.mxu3 %v1874_v23 }
 0x2c7   : > { %v1857_v11 = vmax.f32 %v1727_v25, 0.0 }
 0x2c9   : > { %v1873_v27 = vpack.c.bf16 %v1857_v11, %v1855_v26 }
 0x2cb   : > { %2050 = vmatmul.bf16.gmra.mxu2 %v1873_v27 }
 0x2d8   : > { %v2065_v41 = vpop.f32.mrf.mxu3 }
 0x2de   : > { %v2016_v28 = vpop.f32.mrf.mxu2 }
 0x2df   : > { %v2017_v31 = vadd.f32 %v3264_v30, %v2016_v28 }
 0x2e0   : > { %v2067_v29 = vpop.f32.mrf.mxu3 }
 0x2e1   : > { %v2066_v33 = vadd.f32 %v2065_v41, %v2017_v31 }
 0x2e6   : > { %v2018_v45 = vpop.f32.mrf.mxu2 }
 0x2e7   : > { %v2019_v32 = vadd.f32 %v3264_v30, %v2018_v45 }
 0x2e8   : > { %v2070_v34 = vpop.f32.mrf.mxu3 }
 0x2e9   : > { %v2068_v35 = vadd.f32 %v2067_v29, %v2019_v32 }
 0x2eb   : > { %v2849_v36 = vpack.c.bf16 %v2068_v35, %v2066_v33 }
 0x2ed   : > { %2850 = vst [vmem:[%s3273_s28] sm:$0xff] %v2849_v36  }
 0x2ee   : > { %v2021_v38 = vpop.f32.mrf.mxu2 }
 0x2ef   : > { %v2022_v39 = vadd.f32 %v3264_v30, %v2021_v38 }
 0x2f0   : > { %v2072_v37 = vpop.f32.mrf.mxu3 }
 0x2f1   : > { %v2071_v44 = vadd.f32 %v2070_v34, %v2022_v39 }
 0x2f6   : > { %v2023_v40 = vpop.f32.mrf.mxu2 }
 0x2f7   : > { %v2024_v42 = vadd.f32 %v3264_v30, %v2023_v40 }
 0x2f8   : > { %v2075_v43 = vpop.f32.mrf.mxu3 }
 0x2f9   : > { %v2073_v46 = vadd.f32 %v2072_v37, %v2024_v42 }
 0x2fb   : > { %v2854_v47 = vpack.c.bf16 %v2073_v46, %v2071_v44 }
 0x2fd   : > { %2886 = vst [vmem:[%s3273_s28 + $0x8] sm:$0xff] %v2854_v47  }
 0x2fe   : > { %v2026_v48 = vpop.f32.mrf.mxu2 }
 0x2ff   : > { %v2027_v52 = vadd.f32 %v3264_v30, %v2026_v48 }
 0x300   : > { %v2077_v51 = vpop.f32.mrf.mxu3 }
 0x301   : > { %v2076_v56 = vadd.f32 %v2075_v43, %v2027_v52 }
 0x306   : > { %v2028_v53 = vpop.f32.mrf.mxu2 }
 0x307   : > { %v2029_v54 = vadd.f32 %v3264_v30, %v2028_v53 }
 0x308   : > { %v2080_v55 = vpop.f32.mrf.mxu3 }
 0x309   : > { %v2078_v57 = vadd.f32 %v2077_v51, %v2029_v54 }
 0x30b   : > { %v2859_v58 = vpack.c.bf16 %v2078_v57, %v2076_v56 }
 0x30d   : > { %2887 = vst [vmem:[%s3273_s28 + $0x10] sm:$0xff] %v2859_v58  }
 0x30e   : > { %v2031_v59 = vpop.f32.mrf.mxu2 }
 0x30f   : > { %v2032_v61 = vadd.f32 %v3264_v30, %v2031_v59 }
 0x310   : > { %v2082_v60 = vpop.f32.mrf.mxu3 }
 0x311   : > { %v2081_v1 = vadd.f32 %v2080_v55, %v2032_v61 }
 0x316   : > { %v2033_v62 = vpop.f32.mrf.mxu2 }
 0x317   : > { %v2034_v63 = vadd.f32 %v3264_v30, %v2033_v62 }
 0x318   : > { %v2085_v0 = vpop.f32.mrf.mxu3 }
 0x319   : > { %v2083_v2 = vadd.f32 %v2082_v60, %v2034_v63 }
 0x31b   : > { %v2864_v3 = vpack.c.bf16 %v2083_v2, %v2081_v1 }
 0x31d   : > { %2888 = vst [vmem:[%s3273_s28 + $0x18] sm:$0xff] %v2864_v3  }
 0x31e   : > { %v2036_v4 = vpop.f32.mrf.mxu2 }
 0x31f   : > { %v2037_v49 = vadd.f32 %v3264_v30, %v2036_v4 }
 0x320   : > { %v2087_v5 = vpop.f32.mrf.mxu3 }
 0x321   : > { %v2086_v9 = vadd.f32 %v2085_v0, %v2037_v49 }
 0x326   : > { %v2038_v50 = vpop.f32.mrf.mxu2 }
 0x327   : > { %v2039_v6 = vadd.f32 %v3264_v30, %v2038_v50 }
 0x328   : > { %v2090_v8 = vpop.f32.mrf.mxu3 }
 0x329   : > { %v2088_v10 = vadd.f32 %v2087_v5, %v2039_v6 }
 0x32b   : > { %v2869_v12 = vpack.c.bf16 %v2088_v10, %v2086_v9 }
 0x32d   : > { %2889 = vst [vmem:[%s3273_s28 + $0x20] sm:$0xff] %v2869_v12  }
 0x32e   : > { %v2041_v13 = vpop.f32.mrf.mxu2 }
 0x32f   : > { %v2042_v15 = vadd.f32 %v3264_v30, %v2041_v13 }
 0x330   : > { %v2092_v14 = vpop.f32.mrf.mxu3 }
 0x331   : > { %v2091_v18 = vadd.f32 %v2090_v8, %v2042_v15 }
 0x336   : > { %v2043_v16 = vpop.f32.mrf.mxu2 }
 0x337   : > { %v2044_v17 = vadd.f32 %v3264_v30, %v2043_v16 }
 0x338   : > { %v2095_v19 = vpop.f32.mrf.mxu3 }
 0x339   : > { %v2093_v7 = vadd.f32 %v2092_v14, %v2044_v17 }
 0x33b   : > { %v2874_v20 = vpack.c.bf16 %v2093_v7, %v2091_v18 }
 0x33d   : > { %2890 = vst [vmem:[%s3273_s28 + $0x28] sm:$0xff] %v2874_v20  }
 0x33e   : > { %v2046_v21 = vpop.f32.mrf.mxu2 }
 0x33f   : > { %v2047_v23 = vadd.f32 %v3264_v30, %v2046_v21 }
 0x340   : > { %v2097_v22 = vpop.f32.mrf.mxu3 }
 0x341   : > { %v2096_v26 = vadd.f32 %v2095_v19, %v2047_v23 }
 0x346   : > { %v2048_v24 = vpop.f32.mrf.mxu2 }
 0x347   : > { %v2049_v25 = vadd.f32 %v3264_v30, %v2048_v24 }
 0x348   : > { %v2100_v41 = vpop.f32.mrf.mxu3 }
 0x349   : > { %v2098_v11 = vadd.f32 %v2097_v22, %v2049_v25 }
 0x34b   : > { %v2879_v27 = vpack.c.bf16 %v2098_v11, %v2096_v26 }
 0x34d   : > { %2891 = vst [vmem:[%s3273_s28 + $0x30] sm:$0xff] %v2879_v27  }
 0x34e   : > { %v2051_v28 = vpop.f32.mrf.mxu2 }
 0x34f   : > { %v2052_v29 = vadd.f32 %v3264_v30, %v2051_v28 }
 0x350   : > { %v2102_v32 = vpop.f32.mrf.mxu3 }
 0x351   : > { %v2101_v34 = vadd.f32 %v2100_v41, %v2052_v29 }
 0x356   : > { %v2053_v31 = vpop.f32.mrf.mxu2 }
 0x357   : > { %v2054_v45 = vadd.f32 %v3264_v30, %v2053_v31 }
 0x359   : > { %v2103_v33 = vadd.f32 %v2102_v32, %v2054_v45 }
 0x35b   : > { %v2884_v35 = vpack.c.bf16 %v2103_v33, %v2101_v34 }
 0x35d   : > { %2892 = vst [vmem:[%s3273_s28 + $0x38] sm:$0xff] %v2884_v35  }
 0x35e PF: > { %s18_s24 = sadd.s32 1, %s2955_s24  }
 0x35f   : > { %p15_p7 = scmp.ge.s32.totalorder %s18_s24, 4  }
 0x361   :  { %17 = sbr.rel (!%p15_p7) target bundleno = 1 (0x1), region = 87 }
 0x366   :  { %2159 = vsyncpa [#allocation3], 1 }
 0x367   :  { %2161 = vsyncpa [#allocation3 + $0x1], 1 }

</bundles_post_ra>
